<compile_context>
chip_gen: v7x
topology: tpu7x:2x2x1
jax: 0.10.0
libtpu: 0.0.40
codegen_flags: <defaults>
</compile_context>

<pallas_src>
import functools

import jax
import jax.numpy as jnp
from jax import lax
from jax.experimental import pallas as pl
from jax.experimental.pallas import tpu as pltpu


def _fold_bn(gamma, beta, mean, var, eps=1e-5):
    s = gamma / jnp.sqrt(var + eps)
    return s, beta - mean * s                       # (C,), (C,)


def _band_conv3(w, scale, stride, w_in, w_out):
    """3x3 conv (pad=1) -> 3 banded matmul weights, one per ky.

    band[ky] has shape (w_in*Cin, w_out*Cout) with
      band[ky][wi*Cin+ci, j*Cout+co] = w[ky,kx,ci,co]*scale[co]
        iff wi == stride*j + kx - 1 for some kx in {0,1,2}.
    The kx taps, horizontal zero padding and horizontal stride are all encoded
    in the band, so the kernel only needs contiguous ROW slices.
    """
    cin, cout = w.shape[2], w.shape[3]
    ws = (w * scale.reshape(1, 1, 1, cout)).astype(jnp.float32)
    j = jnp.arange(w_out)
    rows = jnp.arange(w_in)
    mats = []
    for ky in range(3):
        m = jnp.zeros((w_in, cin, w_out, cout), jnp.float32)
        for kx in range(3):
            src = stride * j + kx - 1                       # input col per output col
            sel = (rows[:, None] == src[None, :]).astype(jnp.float32)
            m = m + sel[:, None, :, None] * ws[ky, kx][None, :, None, :]
        mats.append(m.reshape(w_in * cin, w_out * cout))
    return jnp.stack(mats)                                   # (3, w_in*Cin, w_out*Cout)


def _band_conv1(w, scale, stride, w_in, w_out):
    """1x1 projection conv (no padding) -> one banded matmul weight."""
    cin, cout = w.shape
    ws = (w * scale.reshape(1, cout)).astype(jnp.float32)
    sel = (jnp.arange(w_in)[:, None] == (stride * jnp.arange(w_out))[None, :])
    m = sel.astype(jnp.float32)[:, None, :, None] * ws[None, :, None, :]
    return m.reshape(w_in * cin, w_out * cout)


def _se_basic_block_kernel(xt_ref, w1_ref, b1_ref, w2_ref, b2_ref,
                           pw1_ref, w2e_ref, *rest,
                           stride, bt, ho, wo, c, has_ds):
    if has_ds:
        wds_ref, bds_ref, o_ref, o1p_s = rest
    else:
        o_ref, o1p_s = rest

    cdt = w1_ref.dtype                          # MXU operand dtype
    woc = wo * c
    wcin = xt_ref.shape[-1]

    def conv1_tap(ky):                          # (bt*Ho, W*Cin), contiguous rows
        if stride == 1:
            t = xt_ref[:, ky:ky + ho, :]
        else:                                   # even/odd row planes
            p, r0 = ky % 2, ky // 2
            t = xt_ref[:, p:p + 1, r0:r0 + ho, :]
        return t.reshape(bt * ho, wcin).astype(cdt)

    # ---- conv1 (BN1 scale folded into the band) + bias + ReLU ---------------
    out1 = jnp.dot(conv1_tap(0), w1_ref[0], preferred_element_type=jnp.float32)
    out1 = out1 + jnp.dot(conv1_tap(1), w1_ref[1], preferred_element_type=jnp.float32)
    out1 = out1 + jnp.dot(conv1_tap(2), w1_ref[2], preferred_element_type=jnp.float32)
    out1 = jnp.maximum(out1 + b1_ref[...], 0.0)               # (bt*Ho, Wo*C)

    # ---- conv1 output stays on-chip; only the 2 halo rows are zeroed --------
    zrow = jnp.zeros((bt, 1, woc), cdt)
    o1p_s[:, 0:1, :] = zrow
    o1p_s[:, ho + 1:ho + 2, :] = zrow
    o1p_s[:, 1:1 + ho, :] = out1.reshape(bt, ho, woc).astype(cdt)

    # ---- conv2 (BN2 scale folded) + bias ------------------------------------
    def conv2_tap(ky):
        return o1p_s[:, ky:ky + ho, :].reshape(bt * ho, woc)

    out2 = jnp.dot(conv2_tap(0), w2_ref[0], preferred_element_type=jnp.float32)
    out2 = out2 + jnp.dot(conv2_tap(1), w2_ref[1], preferred_element_type=jnp.float32)
    out2 = out2 + jnp.dot(conv2_tap(2), w2_ref[2], preferred_element_type=jnp.float32)
    out2 = out2 + b2_ref[...]                                  # (bt*Ho, Wo*C)

    # ---- SE: avg-pool folded into pw1, Wo-broadcast folded into w2e ---------
    out2 = out2.reshape(bt, ho, woc)
    rowsum = jnp.concatenate(
        [jnp.sum(out2[b], axis=0, keepdims=True) for b in range(bt)], axis=0)
    hid = jnp.maximum(
        jnp.dot(rowsum.astype(cdt), pw1_ref[...],
                preferred_element_type=jnp.float32), 0.0)      # (bt, C//r)
    gate = jax.nn.sigmoid(
        jnp.dot(hid.astype(cdt), w2e_ref[...],
                preferred_element_type=jnp.float32))           # (bt, Wo*C), EUP exp
    out2 = out2 * gate[:, None, :]

    # ---- shortcut ------------------------------------------------------------
    if has_ds:
        if stride == 1:
            xs = xt_ref[:, 1:1 + ho, :]
        else:
            xs = xt_ref[:, 1:2, 0:ho, :]                       # odd-row plane
        xs = xs.reshape(bt * ho, wcin).astype(cdt)
        ds = jnp.dot(xs, wds_ref[...], preferred_element_type=jnp.float32)
        ds = (ds + bds_ref[...]).reshape(bt, ho, woc)
    else:                                                      # identity: exact f32 add
        ds = xt_ref[:, 1:1 + ho, :].astype(jnp.float32)

    # ---- residual add + ReLU, lane-dense store -------------------------------
    o_ref[...] = jnp.maximum(out2 + ds, 0.0).astype(o_ref.dtype)


def se_basic_block(x_nchw, params, *, stride=1, matmul_dtype=jnp.bfloat16,
                   batch_tile=None):
    """SEBasicBlock forward.  x_nchw: (N, Cin, H, W) f32 -> (N, C, Ho, Wo) f32."""
    assert stride in (1, 2)
    x = jnp.transpose(x_nchw, (0, 2, 3, 1)).astype(jnp.float32)      # NHWC
    n, h, w, cin = x.shape
    c = params["w1"].shape[-1]
    r = params["wse1"].shape[-1]
    ho = (h - 1) // stride + 1
    wo = (w - 1) // stride + 1
    woc = wo * c
    has_ds = "wds" in params
    if not has_ds:
        assert stride == 1 and cin == c, "identity shortcut needs stride=1, Cin==planes"

    cdt = matmul_dtype
    s1, b1 = _fold_bn(*params["bn1"])
    s2, b2 = _fold_bn(*params["bn2"])

    # conv weights -> banded matmul matrices (BN scales folded into columns)
    w1b = _band_conv3(params["w1"], s1, stride, w, wo).astype(cdt)    # (3, W*Cin, Wo*C)
    w2b = _band_conv3(params["w2"], s2, 1, wo, wo).astype(cdt)        # (3, Wo*C, Wo*C)
    b1m = jnp.tile(b1.reshape(1, c), (1, wo))                         # (1, Wo*C)
    b2m = jnp.tile(b2.reshape(1, c), (1, wo))

    # SE weights: fold the spatial average pool into fc1 and the Wo-wise gate
    # broadcast into fc2 (gate comes out of the kernel already as (B, Wo*C)).
    pool = jnp.tile(jnp.eye(c, dtype=jnp.float32), (wo, 1)) / (ho * wo)   # (Wo*C, C)
    pw1 = (pool @ params["wse1"]).astype(cdt)                          # (Wo*C, C//r)
    w2e = jnp.tile(params["wse2"], (1, wo)).astype(cdt)                # (C//r, Wo*C)

    if has_ds:
        sds, bds = _fold_bn(*params["bnds"])
        wdsb = _band_conv1(params["wds"], sds, stride, w, wo).astype(cdt)  # (W*Cin, Wo*C)
        bdsm = jnp.tile(bds.reshape(1, c), (1, wo))

    # ---- input: vertical zero-pad only; W and Cin merged on the lane axis ----
    in_dtype = cdt if has_ds else jnp.float32     # identity residual stays exact f32
    xm = jnp.pad(x, ((0, 0), (1, 1), (0, 0), (0, 0))).reshape(n, h + 2, w * cin)
    xm = xm.astype(in_dtype)

    # batch tile: fold a few images into the matmul M axis, but keep >=2
    # parallel grid steps when possible (v7x has 2 TensorCores per chip).
    bt = batch_tile if batch_tile is not None else max(1, min(4, n // 2))
    npad = -(-n // bt) * bt
    if npad != n:
        xm = jnp.pad(xm, ((0, npad - n), (0, 0), (0, 0)))

    if stride == 1:
        xt = xm
        xt_spec = pl.BlockSpec((bt, h + 2, w * cin), lambda i: (i, 0, 0))
    else:
        # even/odd ROW planes -> every in-kernel row tap is a contiguous slice
        rows_pad = 2 * (ho + 1)
        xt = jnp.pad(xm, ((0, 0), (0, rows_pad - (h + 2)), (0, 0)))
        xt = xt.reshape(npad, ho + 1, 2, w * cin).transpose(0, 2, 1, 3)
        xt_spec = pl.BlockSpec((bt, 2, ho + 1, w * cin), lambda i: (i, 0, 0, 0))

    def full_spec(a):
        zeros = (0,) * a.ndim
        return pl.BlockSpec(a.shape, lambda i: zeros)     # resident across grid

    inputs = [xt, w1b, b1m, w2b, b2m, pw1, w2e]
    in_specs = [xt_spec] + [full_spec(a) for a in inputs[1:]]
    if has_ds:
        inputs += [wdsb, bdsm]
        in_specs += [full_spec(wdsb), full_spec(bdsm)]

    flops = 2 * npad * ho * (3 * (w * cin) * woc + 3 * woc * woc
                             + (w * cin) * woc * int(has_ds)) \
        + 2 * npad * (woc * r + r * woc)
    bytes_accessed = (xt.size * xt.dtype.itemsize
                      + sum(a.size * a.dtype.itemsize for a in inputs[1:])
                      + npad * ho * woc * 4)

    out = pl.pallas_call(
        functools.partial(_se_basic_block_kernel, stride=stride, bt=bt,
                          ho=ho, wo=wo, c=c, has_ds=has_ds),
        out_shape=jax.ShapeDtypeStruct((npad, ho, woc), jnp.float32),
        grid=(npad // bt,),
        in_specs=in_specs,
        out_specs=pl.BlockSpec((bt, ho, woc), lambda i: (i, 0, 0)),
        scratch_shapes=[pltpu.VMEM((bt, ho + 2, woc), cdt)],
        compiler_params=pltpu.CompilerParams(
            dimension_semantics=("parallel",),
            vmem_limit_bytes=32 * 1024 * 1024),
        cost_estimate=pl.CostEstimate(flops=flops, transcendentals=npad * woc,
                                      bytes_accessed=bytes_accessed),
    )(*inputs)

    out = out[:n].reshape(n, ho, wo, c)
    return jnp.transpose(out, (0, 3, 1, 2))               # -> NCHW


# ---------------- pure-JAX reference (correctness check) ----------------
def reference(x_nchw, params, *, stride=1):
    x = jnp.transpose(x_nchw, (0, 2, 3, 1)).astype(jnp.float32)
    hp = lax.Precision.HIGHEST
    conv = lambda a, w, s, pad: lax.conv_general_dilated(
        a, w, (s, s), pad, dimension_numbers=("NHWC", "HWIO", "NHWC"),
        precision=hp)
    s1, b1 = _fold_bn(*params["bn1"])
    s2, b2 = _fold_bn(*params["bn2"])
    out = jnp.maximum(conv(x, params["w1"], stride, ((1, 1), (1, 1))) * s1 + b1, 0.0)
    out2 = conv(out, params["w2"], 1, ((1, 1), (1, 1))) * s2 + b2
    avg = out2.mean(axis=(1, 2))
    hid = jnp.maximum(jnp.dot(avg, params["wse1"], precision=hp), 0.0)
    gate = jax.nn.sigmoid(jnp.dot(hid, params["wse2"], precision=hp))
    out2 = out2 * gate[:, None, None, :]
    if "wds" in params:
        sds, bds = _fold_bn(*params["bnds"])
        ds = conv(x, params["wds"][None, None], stride, ((0, 0), (0, 0))) * sds + bds
    else:
        ds = x
    return jnp.transpose(jnp.maximum(out2 + ds, 0.0), (0, 3, 1, 2))


def _bn_params(k, ch):
    k1, k2, k3, k4 = jax.random.split(k, 4)
    return (1.0 + 0.1 * jax.random.normal(k1, (ch,)),
            0.1 * jax.random.normal(k2, (ch,)),
            0.1 * jax.random.normal(k3, (ch,)),
            0.5 + jax.random.uniform(k4, (ch,)))


def make_params(key, *, cin, planes, reduction=8, with_ds=True):
    ks = jax.random.split(key, 8)
    p = {
        "w1": 0.2 * jax.random.normal(ks[0], (3, 3, cin, planes)),
        "bn1": _bn_params(ks[1], planes),
        "w2": 0.2 * jax.random.normal(ks[2], (3, 3, planes, planes)),
        "bn2": _bn_params(ks[3], planes),
        "wse1": 0.3 * jax.random.normal(ks[4], (planes, planes // reduction)),
        "wse2": 0.3 * jax.random.normal(ks[5], (planes // reduction, planes)),
    }
    if with_ds:
        p["wds"] = 0.2 * jax.random.normal(ks[6], (cin, planes))
        p["bnds"] = _bn_params(ks[7], planes)
    return jax.tree_util.tree_map(lambda a: a.astype(jnp.float32), p)


def _check(x, params, stride, label):
    ref = reference(x, params, stride=stride)
    # structural check with f32 MXU operands (tight tolerance)
    out32 = jax.block_until_ready(
        se_basic_block(x, params, stride=stride, matmul_dtype=jnp.float32))
    assert out32.shape == ref.shape, (label, out32.shape, ref.shape)
    err32 = float(jnp.max(jnp.abs(out32 - ref)))
    assert jnp.allclose(out32, ref, atol=1e-3, rtol=1e-3), f"{label} f32 err={err32}"
    # production path: bf16 MXU operands, f32 accumulation (loose tolerance)
    outbf = jax.block_until_ready(
        se_basic_block(x, params, stride=stride, matmul_dtype=jnp.bfloat16))
    scale = float(jnp.max(jnp.abs(ref)))
    errbf = float(jnp.max(jnp.abs(outbf - ref)))
    assert errbf <= 0.05 * scale + 0.05, f"{label} bf16 err={errbf} scale={scale}"


if __name__ == "__main__":
    key = jax.random.PRNGKey(0)
    k_a, k_b, k_c, k_d, kx1, kx2, kx3, kx4 = jax.random.split(key, 8)

    # case 1: projection shortcut (Cin != planes), stride 1
    p1 = make_params(k_a, cin=4, planes=16)
    x1 = jax.random.normal(kx1, (2, 4, 16, 16), dtype=jnp.float32)
    _check(x1, p1, stride=1, label="stride1_proj")

    # case 2: downsampling block, stride 2
    p2 = make_params(k_b, cin=4, planes=16)
    x2 = jax.random.normal(kx2, (2, 4, 16, 16), dtype=jnp.float32)
    _check(x2, p2, stride=2, label="stride2_proj")

    # case 3: identity shortcut (Cin == planes, stride 1, empty downsample)
    p3 = make_params(k_c, cin=16, planes=16, with_ds=False)
    x3 = jax.random.normal(kx3, (2, 16, 16, 16), dtype=jnp.float32)
    _check(x3, p3, stride=1, label="stride1_identity")

    # case 4: batch tile > 1 (4 images -> 2 per grid step, 2 parallel steps)
    p4 = make_params(k_d, cin=4, planes=16)
    x4 = jax.random.normal(kx4, (4, 4, 16, 16), dtype=jnp.float32)
    _check(x4, p4, stride=1, label="stride1_proj_bt2")

    print("KERNEL_OK")
</pallas_src>

<mosaic_0001>
module attributes {stable_mosaic.version = 11 : i64} {
  func.func @_se_basic_block_kernel(%arg0: i32, %arg1: memref<1x18x64xf32, #tpu.memory_space<vmem>>, %arg2: memref<3x64x256xf32, #tpu.memory_space<vmem>>, %arg3: memref<1x256xf32, #tpu.memory_space<vmem>>, %arg4: memref<3x256x256xf32, #tpu.memory_space<vmem>>, %arg5: memref<1x256xf32, #tpu.memory_space<vmem>>, %arg6: memref<256x2xf32, #tpu.memory_space<vmem>>, %arg7: memref<2x256xf32, #tpu.memory_space<vmem>>, %arg8: memref<64x256xf32, #tpu.memory_space<vmem>>, %arg9: memref<1x256xf32, #tpu.memory_space<vmem>>, %arg10: memref<1x16x256xf32, #tpu.memory_space<vmem>>, %arg11: memref<1x18x256xf32, #tpu.memory_space<vmem>>) attributes {dimension_semantics = [#tpu.dimension_semantics<parallel>], iteration_bounds = array<i64: 2>, scalar_prefetch = 0 : i64, scratch_operands = 1 : i64, tpu.core_type = #tpu.core_type<tc>, window_params = [{transform_indices = @transform_0, window_bounds = array<i64: 1, 18, 64>}, {pipeline_mode = #tpu.pipeline_mode<synchronous>, transform_indices = @transform_1, window_bounds = array<i64: 3, 64, 256>}, {pipeline_mode = #tpu.pipeline_mode<synchronous>, transform_indices = @transform_2, window_bounds = array<i64: 1, 256>}, {pipeline_mode = #tpu.pipeline_mode<synchronous>, transform_indices = @transform_3, window_bounds = array<i64: 3, 256, 256>}, {pipeline_mode = #tpu.pipeline_mode<synchronous>, transform_indices = @transform_4, window_bounds = array<i64: 1, 256>}, {pipeline_mode = #tpu.pipeline_mode<synchronous>, transform_indices = @transform_5, window_bounds = array<i64: 256, 2>}, {pipeline_mode = #tpu.pipeline_mode<synchronous>, transform_indices = @transform_6, window_bounds = array<i64: 2, 256>}, {pipeline_mode = #tpu.pipeline_mode<synchronous>, transform_indices = @transform_7, window_bounds = array<i64: 64, 256>}, {pipeline_mode = #tpu.pipeline_mode<synchronous>, transform_indices = @transform_8, window_bounds = array<i64: 1, 256>}, {transform_indices = @transform_9, window_bounds = array<i64: 1, 16, 256>}]} {
    %c0 = arith.constant 0 : index
    %c0_0 = arith.constant 0 : index
    %c0_1 = arith.constant 0 : index
    %0 = vector.load %arg1[%c0, %c0_0, %c0_1] : memref<1x18x64xf32, #tpu.memory_space<vmem>>, vector<1x16x64xf32>
    %1 = vector.shape_cast %0 : vector<1x16x64xf32> to vector<16x64xf32>
    %c0_2 = arith.constant 0 : index
    %c0_3 = arith.constant 0 : index
    %c0_4 = arith.constant 0 : index
    %2 = vector.load %arg2[%c0_2, %c0_3, %c0_4] : memref<3x64x256xf32, #tpu.memory_space<vmem>>, vector<1x64x256xf32>
    %3 = vector.shape_cast %2 : vector<1x64x256xf32> to vector<64x256xf32>
    %cst = arith.constant dense<0.000000e+00> : vector<16x256xf32>
    %4 = tpu.matmul %1, %3, %cst {dimension_numbers = #tpu.dot_dimension_numbers<[1], [0], [0], [1], [0, 0, 1, 1], [], []>} : vector<16x64xf32>, vector<64x256xf32>, vector<16x256xf32> -> vector<16x256xf32>
    %c0_5 = arith.constant 0 : index
    %c1 = arith.constant 1 : index
    %c0_6 = arith.constant 0 : index
    %5 = vector.load %arg1[%c0_5, %c1, %c0_6] : memref<1x18x64xf32, #tpu.memory_space<vmem>>, vector<1x16x64xf32>
    %6 = vector.shape_cast %5 : vector<1x16x64xf32> to vector<16x64xf32>
    %c1_7 = arith.constant 1 : index
    %c0_8 = arith.constant 0 : index
    %c0_9 = arith.constant 0 : index
    %7 = vector.load %arg2[%c1_7, %c0_8, %c0_9] : memref<3x64x256xf32, #tpu.memory_space<vmem>>, vector<1x64x256xf32>
    %8 = vector.shape_cast %7 : vector<1x64x256xf32> to vector<64x256xf32>
    %cst_10 = arith.constant dense<0.000000e+00> : vector<16x256xf32>
    %9 = tpu.matmul %6, %8, %cst_10 {dimension_numbers = #tpu.dot_dimension_numbers<[1], [0], [0], [1], [0, 0, 1, 1], [], []>} : vector<16x64xf32>, vector<64x256xf32>, vector<16x256xf32> -> vector<16x256xf32>
    %10 = arith.addf %4, %9 : vector<16x256xf32>
    %c0_11 = arith.constant 0 : index
    %c2 = arith.constant 2 : index
    %c0_12 = arith.constant 0 : index
    %11 = vector.load %arg1[%c0_11, %c2, %c0_12] : memref<1x18x64xf32, #tpu.memory_space<vmem>>, vector<1x16x64xf32>
    %12 = vector.shape_cast %11 : vector<1x16x64xf32> to vector<16x64xf32>
    %c2_13 = arith.constant 2 : index
    %c0_14 = arith.constant 0 : index
    %c0_15 = arith.constant 0 : index
    %13 = vector.load %arg2[%c2_13, %c0_14, %c0_15] : memref<3x64x256xf32, #tpu.memory_space<vmem>>, vector<1x64x256xf32>
    %14 = vector.shape_cast %13 : vector<1x64x256xf32> to vector<64x256xf32>
    %cst_16 = arith.constant dense<0.000000e+00> : vector<16x256xf32>
    %15 = tpu.matmul %12, %14, %cst_16 {dimension_numbers = #tpu.dot_dimension_numbers<[1], [0], [0], [1], [0, 0, 1, 1], [], []>} : vector<16x64xf32>, vector<64x256xf32>, vector<16x256xf32> -> vector<16x256xf32>
    %16 = arith.addf %10, %15 : vector<16x256xf32>
    %c0_17 = arith.constant 0 : index
    %c0_18 = arith.constant 0 : index
    %17 = vector.load %arg3[%c0_17, %c0_18] : memref<1x256xf32, #tpu.memory_space<vmem>>, vector<1x256xf32>
    %18 = vector.broadcast %17 : vector<1x256xf32> to vector<16x256xf32>
    %19 = arith.addf %16, %18 : vector<16x256xf32>
    %cst_19 = arith.constant 0.000000e+00 : f32
    %20 = vector.broadcast %cst_19 : f32 to vector<16x256xf32>
    %21 = arith.maximumf %19, %20 : vector<16x256xf32>
    %cst_20 = arith.constant 0.000000e+00 : f32
    %22 = vector.broadcast %cst_20 : f32 to vector<1x1x256xf32>
    %c0_21 = arith.constant 0 : index
    %c0_22 = arith.constant 0 : index
    %c0_23 = arith.constant 0 : index
    %23 = vector.load %arg11[%c0_21, %c0_22, %c0_23] : memref<1x18x256xf32, #tpu.memory_space<vmem>>, vector<1x1x256xf32>
    tpu.vector_store %arg11[%c0_21, %c0_22, %c0_23], %22 {strides = array<i32>} : memref<1x18x256xf32, #tpu.memory_space<vmem>>, vector<1x1x256xf32>,
    %c0_24 = arith.constant 0 : index
    %c17 = arith.constant 17 : index
    %c0_25 = arith.constant 0 : index
    %24 = vector.load %arg11[%c0_24, %c17, %c0_25] : memref<1x18x256xf32, #tpu.memory_space<vmem>>, vector<1x1x256xf32>
    tpu.vector_store %arg11[%c0_24, %c17, %c0_25], %22 {strides = array<i32>} : memref<1x18x256xf32, #tpu.memory_space<vmem>>, vector<1x1x256xf32>,
    %25 = vector.shape_cast %21 : vector<16x256xf32> to vector<1x16x256xf32>
    %c0_26 = arith.constant 0 : index
    %c1_27 = arith.constant 1 : index
    %c0_28 = arith.constant 0 : index
    %26 = vector.load %arg11[%c0_26, %c1_27, %c0_28] : memref<1x18x256xf32, #tpu.memory_space<vmem>>, vector<1x16x256xf32>
    tpu.vector_store %arg11[%c0_26, %c1_27, %c0_28], %25 {strides = array<i32>} : memref<1x18x256xf32, #tpu.memory_space<vmem>>, vector<1x16x256xf32>,
    %c0_29 = arith.constant 0 : index
    %c0_30 = arith.constant 0 : index
    %c0_31 = arith.constant 0 : index
    %27 = vector.load %arg11[%c0_29, %c0_30, %c0_31] : memref<1x18x256xf32, #tpu.memory_space<vmem>>, vector<1x16x256xf32>
    %28 = vector.shape_cast %27 : vector<1x16x256xf32> to vector<16x256xf32>
    %c0_32 = arith.constant 0 : index
    %c0_33 = arith.constant 0 : index
    %c0_34 = arith.constant 0 : index
    %29 = vector.load %arg4[%c0_32, %c0_33, %c0_34] : memref<3x256x256xf32, #tpu.memory_space<vmem>>, vector<1x256x256xf32>
    %30 = vector.shape_cast %29 : vector<1x256x256xf32> to vector<256x256xf32>
    %cst_35 = arith.constant dense<0.000000e+00> : vector<16x256xf32>
    %31 = tpu.matmul %28, %30, %cst_35 {dimension_numbers = #tpu.dot_dimension_numbers<[1], [0], [0], [1], [0, 0, 1, 1], [], []>} : vector<16x256xf32>, vector<256x256xf32>, vector<16x256xf32> -> vector<16x256xf32>
    %c0_36 = arith.constant 0 : index
    %c1_37 = arith.constant 1 : index
    %c0_38 = arith.constant 0 : index
    %32 = vector.load %arg11[%c0_36, %c1_37, %c0_38] : memref<1x18x256xf32, #tpu.memory_space<vmem>>, vector<1x16x256xf32>
    %33 = vector.shape_cast %32 : vector<1x16x256xf32> to vector<16x256xf32>
    %c1_39 = arith.constant 1 : index
    %c0_40 = arith.constant 0 : index
    %c0_41 = arith.constant 0 : index
    %34 = vector.load %arg4[%c1_39, %c0_40, %c0_41] : memref<3x256x256xf32, #tpu.memory_space<vmem>>, vector<1x256x256xf32>
    %35 = vector.shape_cast %34 : vector<1x256x256xf32> to vector<256x256xf32>
    %cst_42 = arith.constant dense<0.000000e+00> : vector<16x256xf32>
    %36 = tpu.matmul %33, %35, %cst_42 {dimension_numbers = #tpu.dot_dimension_numbers<[1], [0], [0], [1], [0, 0, 1, 1], [], []>} : vector<16x256xf32>, vector<256x256xf32>, vector<16x256xf32> -> vector<16x256xf32>
    %37 = arith.addf %31, %36 : vector<16x256xf32>
    %c0_43 = arith.constant 0 : index
    %c2_44 = arith.constant 2 : index
    %c0_45 = arith.constant 0 : index
    %38 = vector.load %arg11[%c0_43, %c2_44, %c0_45] : memref<1x18x256xf32, #tpu.memory_space<vmem>>, vector<1x16x256xf32>
    %39 = vector.shape_cast %38 : vector<1x16x256xf32> to vector<16x256xf32>
    %c2_46 = arith.constant 2 : index
    %c0_47 = arith.constant 0 : index
    %c0_48 = arith.constant 0 : index
    %40 = vector.load %arg4[%c2_46, %c0_47, %c0_48] : memref<3x256x256xf32, #tpu.memory_space<vmem>>, vector<1x256x256xf32>
    %41 = vector.shape_cast %40 : vector<1x256x256xf32> to vector<256x256xf32>
    %cst_49 = arith.constant dense<0.000000e+00> : vector<16x256xf32>
    %42 = tpu.matmul %39, %41, %cst_49 {dimension_numbers = #tpu.dot_dimension_numbers<[1], [0], [0], [1], [0, 0, 1, 1], [], []>} : vector<16x256xf32>, vector<256x256xf32>, vector<16x256xf32> -> vector<16x256xf32>
    %43 = arith.addf %37, %42 : vector<16x256xf32>
    %c0_50 = arith.constant 0 : index
    %c0_51 = arith.constant 0 : index
    %44 = vector.load %arg5[%c0_50, %c0_51] : memref<1x256xf32, #tpu.memory_space<vmem>>, vector<1x256xf32>
    %45 = vector.broadcast %44 : vector<1x256xf32> to vector<16x256xf32>
    %46 = arith.addf %43, %45 : vector<16x256xf32>
    %47 = vector.shape_cast %46 : vector<16x256xf32> to vector<1x16x256xf32>
    %48 = vector.shape_cast %47 : vector<1x16x256xf32> to vector<16x256xf32>
    %cst_52 = arith.constant dense<0.000000e+00> : vector<256xf32>
    %49 = vector.multi_reduction <add>, %48, %cst_52 [0] : vector<16x256xf32> to vector<256xf32>
    %50 = vector.shape_cast %49 : vector<256xf32> to vector<1x256xf32>
    %c0_53 = arith.constant 0 : index
    %c0_54 = arith.constant 0 : index
    %51 = vector.load %arg6[%c0_53, %c0_54] : memref<256x2xf32, #tpu.memory_space<vmem>>, vector<256x2xf32>
    %cst_55 = arith.constant dense<0.000000e+00> : vector<1x2xf32>
    %52 = tpu.matmul %50, %51, %cst_55 {dimension_numbers = #tpu.dot_dimension_numbers<[1], [0], [0], [1], [0, 0, 1, 1], [], []>} : vector<1x256xf32>, vector<256x2xf32>, vector<1x2xf32> -> vector<1x2xf32>
    %cst_56 = arith.constant 0.000000e+00 : f32
    %53 = vector.broadcast %cst_56 : f32 to vector<1x2xf32>
    %54 = arith.maximumf %52, %53 : vector<1x2xf32>
    %c0_57 = arith.constant 0 : index
    %c0_58 = arith.constant 0 : index
    %55 = vector.load %arg7[%c0_57, %c0_58] : memref<2x256xf32, #tpu.memory_space<vmem>>, vector<2x256xf32>
    %cst_59 = arith.constant dense<0.000000e+00> : vector<1x256xf32>
    %56 = tpu.matmul %54, %55, %cst_59 {dimension_numbers = #tpu.dot_dimension_numbers<[1], [0], [0], [1], [0, 0, 1, 1], [], []>} : vector<1x2xf32>, vector<2x256xf32>, vector<1x256xf32> -> vector<1x256xf32>
    %57 = arith.negf %56 : vector<1x256xf32>
    %58 = math.exp %57 : vector<1x256xf32>
    %cst_60 = arith.constant 1.000000e+00 : f32
    %59 = vector.broadcast %cst_60 : f32 to vector<1x256xf32>
    %60 = arith.addf %59, %58 : vector<1x256xf32>
    %61 = arith.divf %59, %60 : vector<1x256xf32>
    %62 = vector.shape_cast %61 : vector<1x256xf32> to vector<1x1x256xf32>
    %63 = vector.broadcast %62 : vector<1x1x256xf32> to vector<1x16x256xf32>
    %64 = arith.mulf %47, %63 : vector<1x16x256xf32>
    %c0_61 = arith.constant 0 : index
    %c1_62 = arith.constant 1 : index
    %c0_63 = arith.constant 0 : index
    %65 = vector.load %arg1[%c0_61, %c1_62, %c0_63] : memref<1x18x64xf32, #tpu.memory_space<vmem>>, vector<1x16x64xf32>
    %66 = vector.shape_cast %65 : vector<1x16x64xf32> to vector<16x64xf32>
    %c0_64 = arith.constant 0 : index
    %c0_65 = arith.constant 0 : index
    %67 = vector.load %arg8[%c0_64, %c0_65] : memref<64x256xf32, #tpu.memory_space<vmem>>, vector<64x256xf32>
    %cst_66 = arith.constant dense<0.000000e+00> : vector<16x256xf32>
    %68 = tpu.matmul %66, %67, %cst_66 {dimension_numbers = #tpu.dot_dimension_numbers<[1], [0], [0], [1], [0, 0, 1, 1], [], []>} : vector<16x64xf32>, vector<64x256xf32>, vector<16x256xf32> -> vector<16x256xf32>
    %c0_67 = arith.constant 0 : index
    %c0_68 = arith.constant 0 : index
    %69 = vector.load %arg9[%c0_67, %c0_68] : memref<1x256xf32, #tpu.memory_space<vmem>>, vector<1x256xf32>
    %70 = vector.broadcast %69 : vector<1x256xf32> to vector<16x256xf32>
    %71 = arith.addf %68, %70 : vector<16x256xf32>
    %72 = vector.shape_cast %71 : vector<16x256xf32> to vector<1x16x256xf32>
    %73 = arith.addf %64, %72 : vector<1x16x256xf32>
    %cst_69 = arith.constant 0.000000e+00 : f32
    %74 = vector.broadcast %cst_69 : f32 to vector<1x16x256xf32>
    %75 = arith.maximumf %73, %74 : vector<1x16x256xf32>
    %c0_70 = arith.constant 0 : index
    %c0_71 = arith.constant 0 : index
    %c0_72 = arith.constant 0 : index
    %76 = vector.load %arg10[%c0_70, %c0_71, %c0_72] : memref<1x16x256xf32, #tpu.memory_space<vmem>>, vector<1x16x256xf32>
    tpu.vector_store %arg10[%c0_70, %c0_71, %c0_72], %75 {strides = array<i32>} : memref<1x16x256xf32, #tpu.memory_space<vmem>>, vector<1x16x256xf32>,
    return
  }
  func.func @transform_0(%arg0: i32) -> (i32, i32, i32) {
    %c0_i32 = arith.constant 0 : i32
    %c0_i32_0 = arith.constant 0 : i32
    %c0_i32_1 = arith.constant 0 : i32
    return %arg0, %c0_i32, %c0_i32_0 : i32, i32, i32
  }
  func.func @transform_1(%arg0: i32) -> (i32, i32, i32) {
    %c0_i32 = arith.constant 0 : i32
    %c0_i32_0 = arith.constant 0 : i32
    %c0_i32_1 = arith.constant 0 : i32
    %c0_i32_2 = arith.constant 0 : i32
    return %c0_i32, %c0_i32_0, %c0_i32_1 : i32, i32, i32
  }
  func.func @transform_2(%arg0: i32) -> (i32, i32) {
    %c0_i32 = arith.constant 0 : i32
    %c0_i32_0 = arith.constant 0 : i32
    %c0_i32_1 = arith.constant 0 : i32
    return %c0_i32, %c0_i32_0 : i32, i32
  }
  func.func @transform_3(%arg0: i32) -> (i32, i32, i32) {
    %c0_i32 = arith.constant 0 : i32
    %c0_i32_0 = arith.constant 0 : i32
    %c0_i32_1 = arith.constant 0 : i32
    %c0_i32_2 = arith.constant 0 : i32
    return %c0_i32, %c0_i32_0, %c0_i32_1 : i32, i32, i32
  }
  func.func @transform_4(%arg0: i32) -> (i32, i32) {
    %c0_i32 = arith.constant 0 : i32
    %c0_i32_0 = arith.constant 0 : i32
    %c0_i32_1 = arith.constant 0 : i32
    return %c0_i32, %c0_i32_0 : i32, i32
  }
  func.func @transform_5(%arg0: i32) -> (i32, i32) {
    %c0_i32 = arith.constant 0 : i32
    %c0_i32_0 = arith.constant 0 : i32
    %c0_i32_1 = arith.constant 0 : i32
    return %c0_i32, %c0_i32_0 : i32, i32
  }
  func.func @transform_6(%arg0: i32) -> (i32, i32) {
    %c0_i32 = arith.constant 0 : i32
    %c0_i32_0 = arith.constant 0 : i32
    %c0_i32_1 = arith.constant 0 : i32
    return %c0_i32, %c0_i32_0 : i32, i32
  }
  func.func @transform_7(%arg0: i32) -> (i32, i32) {
    %c0_i32 = arith.constant 0 : i32
    %c0_i32_0 = arith.constant 0 : i32
    %c0_i32_1 = arith.constant 0 : i32
    return %c0_i32, %c0_i32_0 : i32, i32
  }
  func.func @transform_8(%arg0: i32) -> (i32, i32) {
    %c0_i32 = arith.constant 0 : i32
    %c0_i32_0 = arith.constant 0 : i32
    %c0_i32_1 = arith.constant 0 : i32
    return %c0_i32, %c0_i32_0 : i32, i32
  }
  func.func @transform_9(%arg0: i32) -> (i32, i32, i32) {
    %c0_i32 = arith.constant 0 : i32
    %c0_i32_0 = arith.constant 0 : i32
    %c0_i32_1 = arith.constant 0 : i32
    return %arg0, %c0_i32, %c0_i32_0 : i32, i32, i32
  }
}

</mosaic_0001>

<bundles_post_ra>
// kernel: tpu_custom_call.1
= control target key start
LH: loop header
LB: loop body
LE: loop exit
PB: predicated region body
PF: predicated region fallthrough
CT: control target
= control target key end

     0   :  { %14 = vsyncpa [#allocation4], 0  ;;  %s2721_s0 = inlined_call_operand.vmem [shape: f32[2,18,64], index: 0, kind: input, shape index: {}]   ;;  %s2722_s1 = inlined_call_operand.hbm [shape: f32[3,64,256], index: 1, kind: input, shape index: {}]   ;;  %s2723_s2 = inlined_call_operand.vmem [shape: f32[1,256], index: 2, kind: input, shape index: {}]   ;;  %s2724_s3 = inlined_call_operand.hbm [shape: f32[3,256,256], index: 3, kind: input, shape index: {}]   ;;  %s2725_s4 = inlined_call_operand.vmem [shape: f32[1,256], index: 4, kind: input, shape index: {}]   ;;  %s2726_s5 = inlined_call_operand.vmem [shape: f32[256,2], index: 5, kind: input, shape index: {}]   ;;  %s2727_s6 = inlined_call_operand.vmem [shape: f32[2,256], index: 6, kind: input, shape index: {}]   ;;  %s2728_s7 = inlined_call_operand.vmem [shape: f32[64,256], index: 7, kind: input, shape index: {}]   ;;  %s2729_s8 = inlined_call_operand.vmem [shape: f32[1,256], index: 8, kind: input, shape index: {}]   ;;  %s2730_s9 = inlined_call_operand.hbm [shape: f32[2,16,256], index: 9, kind: output, shape index: {}]  }
   0x1   :  { %15 = vsyncpa [#allocation7], 0 }
   0x2   :  { %16 = vsyncpa [#allocation5], 0 }
   0x3   :  { %18 = vsyncpa [#allocation5 + $0x1], 0  ;;  %s2303_s30 = smov 0   ;;  %s2305_s10 = smov 0  }
   0x4   :  { %s2307_s11 = smov 0   ;;  %s2309_s12 = smov 0  }
   0x5 LB: > { %2737 = sst [smem:[#allocation12_spill]] %s2239_s11  ;;  %s2324_s13 = sadd.s32 4294967295, %s2243_s12   ;;  %s2243_s12 = sphi %s2309_s12, %s2751_s12   ;;  %s2239_s11 = sphi %s2307_s11, %s2753_s11   ;;  %s2235_s10 = sphi %s2305_s10, %s2755_s10   ;;  %s2231_s30 = sphi %s2303_s30, %s2754_s30  }
   0x6   : > { %s1674_s14 = sadd.s32 4294967294, %s2243_s12   ;;  %s2328_s15 = sadd.s32 1, %s2243_s12  }
   0x7   : > { %2738 = sst [smem:[#allocation13_spill]] %s2328_s15  ;;  %s225_s16 = sadd.s32 1, %s2239_s11 }
   0x8   : > { %s222_s17 = ssub.s32 %s2243_s12, %s2328_s15  ;;  %p235_p0 = scmp.ne.s32.totalorder %s2239_s11, %s2235_s10 }
   0x9   : > { %p223_p1 = scmp.eq.s32.totalorder %s222_s17, 0  ;;  %p236_p2 = scmp.eq.s32.totalorder %s2324_s13, 1 }
   0xa   : > { %p241_p3 = scmp.ne.s32.totalorder %s2235_s10, %s2231_s30  ;;  %p242_p4 = scmp.eq.s32.totalorder %s1674_s14, 1 }
   0xb   : > { %s2339_s18 = scalar_select %p223_p1, %s2239_s11, %s225_s16  }
   0xc   : > { %p2341_p5 = por %p236_p2, %p235_p0  ;;  %p2345_p6 = por %p242_p4, %p241_p3 }
   0xd   : > { %2739 = sst [smem:[#allocation14_spill]] %s2339_s18  ;;  %p1675_p7 = scmp.ge.s32.totalorder %s2243_s12, 1 }
   0xe   : > { %s2740_s19 = scalar_select %p2341_p5, 1, 0 }
   0xf   : > { %s2741_s20 = scalar_select %p2345_p6, 1, 0 }
  0x10   : > { %p249_p8 = scmp.lt.s32.totalorder %s2243_s12, 3  ;;  %p2731_p9 = scmp.eq.s32.totalorder %s2324_s13, 0 }
  0x11   : > { %s2245_s22 = smov [#allocation3]   ;;  %s2246_s25 = smov [#allocation6]  }
  0x12   : > { %p2352_p10 = pnand %p1675_p7, %p249_p8  ;;  %s261_s23 = sshll.u32 %s2245_s22, 4  ;;  %s262_s23 = int_to_ptr.vmem [resolvable:$true] %s261_s23 }
  0x13   : > { %s277_s26 = sshll.u32 %s2246_s25, 4  ;;  %s2117_s29 = scalar_lea.hbm %s2722_s1, 6144  ;;  %s2364_s26 = int_to_ptr.vmem [resolvable:$true] %s277_s26 }
  0x14   : > { %s2742_s21 = scalar_select %p2352_p10, 1, 0 }
  0x15   : > { %p2054_p11 = pneg %p2352_p10  ;;  %p2118_p13 = scmp.ne.s32.totalorder %s2722_s1, %s2117_s29 }
  0x16   : > { %p2124_p3 = scmp.lt.u32.totalorder %s2117_s29, %s2722_s1 }
  0x17   : > { %p2360_p12 = pnand %p2731_p9, %p2054_p11 }
  0x19   : > { %p2119_p0 = pneg %p2360_p12 }
  0x1b   : > { %p2120_p1 = pnand %p2119_p0, %p2118_p13 }
  0x1d   : > { %p2121_p2 = pneg %p2120_p1 }
  0x1f   : > { %p2126_p4 = pnand %p2124_p3, %p2121_p2 }
  0x21   : > { %2129 = shalt.err (!%p2126_p4)
}
  0x22   : > { %s2130_s25 = scalar_lea.vmem %s262_s23, 6144  ;;  %p2138_p9 = scmp.lt.s32.totalorder %s262_s23, %s262_s23 }
  0x23   : > { %p2131_p7 = scmp.ne.s32.totalorder %s262_s23, %s2130_s25  ;;  %p2139_p6 = scmp.lt.s32.totalorder %s2130_s25, %s2130_s25 }
  0x25   : > { %p2133_p8 = pnand %p2131_p7, %p2119_p0  ;;  %p2140_p5 = por %p2139_p6, %p2138_p9 }
  0x27   : > { %p2134_p11 = pneg %p2133_p8 }
  0x29   : > { %p2141_p10 = pnand %p2140_p5, %p2134_p11 }
  0x2b   : > { %2144 = shalt.err (!%p2141_p10)
}
  0x2c   : > { %s2247_s27 = smov 256   ;;  %s2248_s28 = smov 16  }
  0x2d   : > { %2057 = dma.hbm_to_vmem [thread:$0]  (!%p2360_p12), %s2722_s1, 6144, %s262_s23, [#allocation4], %s2247_s27, %s2247_s27, %s2248_s28  }
  0x2e   : > { %s2145_s22 = scalar_lea.hbm %s2724_s3, 24576 }
  0x2f   : > { %p2146_p13 = scmp.ne.s32.totalorder %s2724_s3, %s2145_s22  ;;  %p2152_p9 = scmp.lt.u32.totalorder %s2145_s22, %s2724_s3 }
  0x31   : > { %p2148_p5 = pnand %p2146_p13, %p2119_p0 }
  0x33   : > { %p2149_p6 = pneg %p2148_p5 }
  0x35   : > { %p2154_p10 = pnand %p2152_p9, %p2149_p6 }
  0x37   : > { %2157 = shalt.err (!%p2154_p10)
}
  0x38   : > { %s2158_s23 = scalar_lea.vmem %s2364_s26, 24576  ;;  %p2166_p4 = scmp.lt.s32.totalorder %s2364_s26, %s2364_s26 }
  0x39   : > { %p2159_p1 = scmp.ne.s32.totalorder %s2364_s26, %s2158_s23  ;;  %p2167_p7 = scmp.lt.s32.totalorder %s2158_s23, %s2158_s23 }
  0x3b   : > { %p2161_p2 = pnand %p2159_p1, %p2119_p0  ;;  %p2168_p8 = por %p2167_p7, %p2166_p4 }
  0x3d   : > { %p2162_p3 = pneg %p2161_p2 }
  0x3f   : > { %p2169_p11 = pnand %p2168_p8, %p2162_p3 }
  0x41   : > { %2172 = shalt.err (!%p2169_p11)
}
  0x42   : > { %2060 = dma.hbm_to_vmem [thread:$0]  (!%p2360_p12), %s2724_s3, 24576, %s2364_s26, [#allocation7], %s2247_s27, %s2247_s27, %s2248_s28  }
  0x43   : > { %p2744_p13 = scmp.ne.s32.totalorder %s2742_s21, 0 }
  0x44   : > { %p2745_p5 = scmp.eq.s32.totalorder (!%p2744_p13), %s2324_s13, 0 }
  0x45   : > { %316 = sbr.rel (%p2744_p13) target bundleno = 1139 (0x473), region = 56 }
  0x4c   : > { %2218 = dma.done.wait (%p2745_p5), [#allocation4], 6144   ;;  %p2746_p0 = pmov %p2745_p5 }
  0x4e   : > { %2220 = vsyncadd (%p2746_p0), [#allocation4], 4294961152  ;;  %p2747_p6 = pmov %p2746_p0 }
  0x4f   : > { %p2748_p9 = pmov %p2746_p0 }
  0x50   : > { %2222 = dma.done.wait (%p2747_p6), [#allocation7], 24576  }
  0x51   : > { %2224 = vsyncadd (%p2748_p9), [#allocation7], 4294942720  ;;  %v2249_v0 = vmov 0.0   ;;  %v383_v1 = vld [vmem:[#allocation3 + $0x88] sm:$0xff]  ;;  %v385_v2 = vld [vmem:[#allocation3 + $0x98] sm:$0xff]  ;;  %p356_p12 = scmp.lt.s32.totalorder %s2324_s13, 1 }
  0x52   : > { %469 = vmatprep.mubr.f32.mxu0 %v2249_v0  ;;  %v382_v3 = vld [vmem:[#allocation3 + $0x80] sm:$0xff]  ;;  %v1739_v4 = vpack.c.bf16 %v385_v2, %v383_v1  ;;  %v384_v5 = vld [vmem:[#allocation3 + $0x90] sm:$0xff]  ;;  %v387_v6 = vld [vmem:[#allocation3 + $0xa8] sm:$0xff]  ;;  %vm398_vm0 = vcmask 523264   ;;  %vm704_vm2 = vcmask 1040384   ;;  %vm866_vm3 = vcmask 1046528  }
  0x53   : > { %v389_v7 = vld [vmem:[#allocation3 + $0xb8] sm:$0xff]  ;;  %v1741_v8 = vpack.c.bf16 %v384_v5, %v382_v3  ;;  %v386_v10 = vld [vmem:[#allocation3 + $0xa0] sm:$0xff]  ;;  %v388_v11 = vld [vmem:[#allocation3 + $0xb0] sm:$0xff]  ;;  %s357_s18 = scalar_select %p356_p12, %s2324_s13, 1  ;;  %vm1108_vm4 = vcmask 1045504   ;;  %vm1351_vm5 = vcmask 1041408  }
  0x54   : > { %v1743_v9 = vpack.c.bf16 %v389_v7, %v387_v6  ;;  %v391_v12 = vld [vmem:[#allocation3 + $0xc8] sm:$0xff]  ;;  %1740 = vmatprep.subr.bf16.mxu0 %v1739_v4  ;;  %v393_v13 = vld [vmem:[#allocation3 + $0xd8] sm:$0xff]  ;;  %v1745_v14 = vpack.c.bf16 %v388_v11, %v386_v10  ;;  %v390_v16 = vld [vmem:[#allocation3 + $0xc0] sm:$0xff]  ;;  %vm1347_vm6 = vcmask 15360   ;;  %s1703_s15 = sshll.u32 %s2324_s13, 9  ;;  %p2749_p1 = scmp.ne.s32.totalorder %s2740_s19, 0 }
  0x55   : > { %1742 = vmatpush1.bf16.msra.mxu0 %v1741_v8  ;;  %v1747_v15 = vpack.c.bf16 %v393_v13, %v391_v12  ;;  %v392_v17 = vld [vmem:[#allocation3 + $0xd0] sm:$0xff]  ;;  %v395_v18 = vld [vmem:[#allocation3 + $0xe8] sm:$0xff]  ;;  %v397_v19 = vld [vmem:[#allocation3 + $0xf8] sm:$0xff]  ;;  %s2043_s21 = smul.u32 24, %s357_s18  ;;  %s2676_s24 = scalar_lea.hbm %s2730_s9, %s1703_s15 }
  0x56   : > { %1744 = vmatprep.subr.bf16.mxu0 %v1743_v9  ;;  %v1749_v20 = vpack.c.bf16 %v392_v17, %v390_v16  ;;  %v1751_v21 = vpack.c.bf16 %v397_v19, %v395_v18  ;;  %v394_v22 = vld [vmem:[#allocation3 + $0xe0] sm:$0xff]  ;;  %v396_v23 = vld [vmem:[#allocation3 + $0xf0] sm:$0xff]  ;;  %v364_v24 = vld [vmem:[#allocation3 + $0x8] sm:$0xff]  ;;  %s2250_s28 = smov [#allocation8]  }
  0x57   : > { %v366_v25 = vld [vmem:[#allocation3 + $0x18] sm:$0xff]  ;;  %v1753_v26 = vpack.c.bf16 %v396_v23, %v394_v22  ;;  %s2431_s27 = scalar_lea.vmem %s2721_s0, %s2043_s21  ;;  %v363_v28 = vld [vmem:[#allocation3] sm:$0xff]  ;;  %v365_v29 = vld [vmem:[#allocation3 + $0x10] sm:$0xff]  ;;  %s2177_s29 = sshll.u32 %s2250_s28, 4  ;;  %s2178_s29 = int_to_ptr.vmem [resolvable:$false] %s2177_s29 }
  0x58   : > { %v1755_v27 = vpack.c.bf16 %v366_v25, %v364_v24  ;;  %v368_v30 = vld [vmem:[#allocation3 + $0x28] sm:$0xff]  ;;  %v370_v31 = vld [vmem:[#allocation3 + $0x38] sm:$0xff]  ;;  %v1757_v33 = vpack.c.bf16 %v365_v29, %v363_v28  ;;  %v367_v34 = vld [vmem:[#allocation3 + $0x20] sm:$0xff]  ;;  %s2179_s14 = scalar_lea.vmem %s2178_s29, 1024 }
  0x59   : > { %1746 = vmatpush1.bf16.msra.mxu0 %v1745_v14  ;;  %v379_v32 = vld [vmem:[%s2431_s27 + $0x1] sm:$0xff]  ;;  %v1759_v35 = vpack.c.bf16 %v370_v31, %v368_v30  ;;  %v372_v37 = vld [vmem:[#allocation3 + $0x48] sm:$0xff]  ;;  %v380_v39 = vld [vmem:[%s2431_s27 + $0x9] sm:$0xff] }
  0x5a   : > { %1748 = vmatprep.subr.bf16.mxu0 %v1747_v15  ;;  %v369_v36 = vld [vmem:[#allocation3 + $0x30] sm:$0xff]  ;;  %v374_v38 = vld [vmem:[#allocation3 + $0x58] sm:$0xff]  ;;  %v728_v40 = vld [vmem:[#allocation6 + $0x8] sm:$0xff] }
  0x5b   : > { %v730_v41 = vld [vmem:[#allocation6 + $0x18] sm:$0xff]  ;;  %v727_v42 = vld [vmem:[#allocation6] sm:$0xff]  ;;  %v729_v44 = vld [vmem:[#allocation6 + $0x10] sm:$0xff]  ;;  %v1761_v47 = vpack.c.bf16 %v369_v36, %v367_v34  ;;  %v1763_v53 = vpack.c.bf16 %v374_v38, %v372_v37 }
  0x5c   : > { %v1851_v43 = vpack.c.bf16 %v730_v41, %v728_v40  ;;  %v732_v45 = vld [vmem:[#allocation6 + $0x28] sm:$0xff]  ;;  %v734_v46 = vld [vmem:[#allocation6 + $0x38] sm:$0xff]  ;;  %v1853_v48 = vpack.c.bf16 %v729_v44, %v727_v42  ;;  %v731_v50 = vld [vmem:[#allocation6 + $0x20] sm:$0xff] }
  0x5d   : > { %1750 = vmatpush1.bf16.msra.mxu0 %v1749_v20  ;;  %v1855_v49 = vpack.c.bf16 %v734_v46, %v732_v45  ;;  %v733_v51 = vld [vmem:[#allocation6 + $0x30] sm:$0xff]  ;;  %v736_v52 = vld [vmem:[#allocation6 + $0x48] sm:$0xff]  ;;  %v371_v54 = vld [vmem:[#allocation3 + $0x40] sm:$0xff] }
  0x5e   : > { %1752 = vmatprep.subr.bf16.mxu0 %v1751_v21  ;;  %v373_v55 = vld [vmem:[#allocation3 + $0x50] sm:$0xff]  ;;  %1852 = vmatprep.subr.bf16.mxu1 %v1851_v43  ;;  %v738_v56 = vld [vmem:[#allocation6 + $0x58] sm:$0xff]  ;;  %v376_v57 = vld [vmem:[#allocation3 + $0x68] sm:$0xff]  ;;  %v1857_v59 = vpack.c.bf16 %v733_v51, %v731_v50 }
  0x5f   : > { %v378_v58 = vld [vmem:[#allocation3 + $0x78] sm:$0xff]  ;;  %1854 = vmatpush1.bf16.msra.mxu1 %v1853_v48  ;;  %v1859_v60 = vpack.c.bf16 %v738_v56, %v736_v52  ;;  %v735_v61 = vld [vmem:[#allocation6 + $0x40] sm:$0xff]  ;;  %v737_v62 = vld [vmem:[#allocation6 + $0x50] sm:$0xff]  ;;  %v1765_v63 = vpack.c.bf16 %v373_v55, %v371_v54 }
  0x60   : > { %1856 = vmatprep.subr.bf16.mxu1 %v1855_v49  ;;  %v740_v1 = vld [vmem:[#allocation6 + $0x68] sm:$0xff]  ;;  %v742_v2 = vld [vmem:[#allocation6 + $0x78] sm:$0xff]  ;;  %v1767_v3 = vpack.c.bf16 %v378_v58, %v376_v57  ;;  %v375_v4 = vld [vmem:[#allocation3 + $0x60] sm:$0xff]  ;;  %v1861_v8 = vpack.c.bf16 %v737_v62, %v735_v61 }
  0x61   : > { %1754 = vmatpush1.bf16.msra.mxu0 %v1753_v26  ;;  %v377_v5 = vld [vmem:[#allocation3 + $0x70] sm:$0xff]  ;;  %v569_v6 = vld [vmem:[#allocation3 + $0x108] sm:$0xff]  ;;  %v571_v7 = vld [vmem:[#allocation3 + $0x118] sm:$0xff]  ;;  %v1863_v9 = vpack.c.bf16 %v742_v2, %v740_v1 }
  0x62   : > { %1756 = vmatprep.subr.bf16.mxu0 %v1755_v27  ;;  %v739_v10 = vld [vmem:[#allocation6 + $0x60] sm:$0xff]  ;;  %v741_v11 = vld [vmem:[#allocation6 + $0x70] sm:$0xff]  ;;  %v1769_v12 = vpack.c.bf16 %v377_v5, %v375_v4  ;;  %v744_v13 = vld [vmem:[#allocation6 + $0x88] sm:$0xff]  ;;  %v1771_v15 = vpack.c.bf16 %v571_v7, %v569_v6 }
  0x63   : > { %1858 = vmatpush1.bf16.msra.mxu1 %v1857_v59  ;;  %v746_v14 = vld [vmem:[#allocation6 + $0x98] sm:$0xff]  ;;  %v568_v16 = vld [vmem:[#allocation3 + $0x100] sm:$0xff]  ;;  %v570_v17 = vld [vmem:[#allocation3 + $0x110] sm:$0xff]  ;;  %v1865_v20 = vpack.c.bf16 %v741_v11, %v739_v10 }
  0x64   : > { %1684 = vmatmul.mubr.msk.f32.vlgmr.msra.gmra.mrb[0].mxu0 %vm398_vm0, %v379_v32  ;;  %1860 = vmatprep.subr.bf16.mxu1 %v1859_v60  ;;  %v573_v18 = vld [vmem:[#allocation3 + $0x128] sm:$0xff]  ;;  %v575_v19 = vld [vmem:[#allocation3 + $0x138] sm:$0xff]  ;;  %v1867_v21 = vpack.c.bf16 %v746_v14, %v744_v13  ;;  %v743_v22 = vld [vmem:[#allocation6 + $0x80] sm:$0xff]  ;;  %v1773_v25 = vpack.c.bf16 %v570_v17, %v568_v16 }
  0x65   : > { %1758 = vmatpush1.bf16.msra.mxu0 %v1757_v33  ;;  %475 = vmatprep.mubr.f32.mxu0 %v2249_v0  ;;  %v745_v23 = vld [vmem:[#allocation6 + $0x90] sm:$0xff]  ;;  %v748_v26 = vld [vmem:[#allocation6 + $0xa8] sm:$0xff]  ;;  %v750_v27 = vld [vmem:[#allocation6 + $0xb8] sm:$0xff]  ;;  %v1775_v28 = vpack.c.bf16 %v575_v19, %v573_v18 }
  0x66   : > { %1760 = vmatprep.subr.bf16.mxu0 %v1759_v35  ;;  %v361_v24 = vld [vmem:[%s2431_s27] sm:$0xff]  ;;  %v572_v29 = vld [vmem:[#allocation3 + $0x120] sm:$0xff]  ;;  %v577_v31 = vld [vmem:[#allocation3 + $0x148] sm:$0xff]  ;;  %v1869_v33 = vpack.c.bf16 %v745_v23, %v743_v22  ;;  %v1871_v34 = vpack.c.bf16 %v750_v27, %v748_v26 }
  0x67   : > { %1862 = vmatpush1.bf16.msra.mxu1 %v1861_v8  ;;  %v574_v30 = vld [vmem:[#allocation3 + $0x130] sm:$0xff]  ;;  %v579_v32 = vld [vmem:[#allocation3 + $0x158] sm:$0xff]  ;;  %v747_v35 = vld [vmem:[#allocation6 + $0xa0] sm:$0xff] }
  0x68   : > { %1685 = vmatmul.mubr.msk.f32.gmra.mrb[2].mxu0 %vm398_vm0, %v380_v39  ;;  %1864 = vmatprep.subr.bf16.mxu1 %v1863_v9  ;;  %v749_v36 = vld [vmem:[#allocation6 + $0xb0] sm:$0xff]  ;;  %v1777_v37 = vpack.c.bf16 %v574_v30, %v572_v29  ;;  %v362_v38 = vld [vmem:[%s2431_s27 + $0x8] sm:$0xff]  ;;  %v752_v39 = vld [vmem:[#allocation6 + $0xc8] sm:$0xff]  ;;  %v1779_v41 = vpack.c.bf16 %v579_v32, %v577_v31 }
  0x69   : > { %1762 = vmatpush1.bf16.msra.mxu0 %v1761_v47  ;;  %552 = vmatprep.mubr.f32.mxu0 %v2249_v0  ;;  %v754_v40 = vld [vmem:[#allocation6 + $0xd8] sm:$0xff]  ;;  %v576_v42 = vld [vmem:[#allocation3 + $0x140] sm:$0xff]  ;;  %v578_v43 = vld [vmem:[#allocation3 + $0x150] sm:$0xff]  ;;  %v1873_v46 = vpack.c.bf16 %v749_v36, %v747_v35 }
  0x6a   : > { %1764 = vmatprep.subr.bf16.mxu0 %v1763_v53  ;;  %v581_v44 = vld [vmem:[#allocation3 + $0x168] sm:$0xff]  ;;  %v583_v45 = vld [vmem:[#allocation3 + $0x178] sm:$0xff]  ;;  %v1875_v47 = vpack.c.bf16 %v754_v40, %v752_v39  ;;  %v751_v48 = vld [vmem:[#allocation6 + $0xc0] sm:$0xff]  ;;  %v1781_v50 = vpack.c.bf16 %v578_v43, %v576_v42 }
  0x6b   : > { %1866 = vmatpush1.bf16.msra.mxu1 %v1865_v20  ;;  %v753_v49 = vld [vmem:[#allocation6 + $0xd0] sm:$0xff]  ;;  %v756_v51 = vld [vmem:[#allocation6 + $0xe8] sm:$0xff]  ;;  %v758_v52 = vld [vmem:[#allocation6 + $0xf8] sm:$0xff]  ;;  %v1783_v53 = vpack.c.bf16 %v583_v45, %v581_v44 }
  0x6c   : > { %1868 = vmatprep.subr.bf16.mxu1 %v1867_v21  ;;  %v580_v54 = vld [vmem:[#allocation3 + $0x160] sm:$0xff]  ;;  %v582_v55 = vld [vmem:[#allocation3 + $0x170] sm:$0xff]  ;;  %v797_v56 = vld [vmem:[#allocation6 + $0x208] sm:$0xff]  ;;  %v1877_v58 = vpack.c.bf16 %v753_v49, %v751_v48  ;;  %v1879_v59 = vpack.c.bf16 %v758_v52, %v756_v51 }
  0x6d   : > { %1766 = vmatpush1.bf16.msra.mxu0 %v1765_v63  ;;  %v799_v57 = vld [vmem:[#allocation6 + $0x218] sm:$0xff]  ;;  %v755_v60 = vld [vmem:[#allocation6 + $0xe0] sm:$0xff]  ;;  %v757_v61 = vld [vmem:[#allocation6 + $0xf0] sm:$0xff]  ;;  %v1785_v62 = vpack.c.bf16 %v582_v55, %v580_v54 }
  0x6e   : > { %1768 = vmatprep.subr.bf16.mxu0 %v1767_v3  ;;  %v760_v63 = vld [vmem:[#allocation6 + $0x108] sm:$0xff]  ;;  %v762_v1 = vld [vmem:[#allocation6 + $0x118] sm:$0xff]  ;;  %v1787_v2 = vpack.c.bf16 %v799_v57, %v797_v56  ;;  %v796_v3 = vld [vmem:[#allocation6 + $0x200] sm:$0xff]  ;;  %v1881_v7 = vpack.c.bf16 %v757_v61, %v755_v60 }
  0x6f   : > { %1870 = vmatpush1.bf16.msra.mxu1 %v1869_v33  ;;  %v798_v4 = vld [vmem:[#allocation6 + $0x210] sm:$0xff]  ;;  %v801_v5 = vld [vmem:[#allocation6 + $0x228] sm:$0xff]  ;;  %v803_v6 = vld [vmem:[#allocation6 + $0x238] sm:$0xff]  ;;  %v1883_v8 = vpack.c.bf16 %v762_v1, %v760_v63 }
  0x70   : > { %1872 = vmatprep.subr.bf16.mxu1 %v1871_v34  ;;  %v759_v9 = vld [vmem:[#allocation6 + $0x100] sm:$0xff]  ;;  %v761_v10 = vld [vmem:[#allocation6 + $0x110] sm:$0xff]  ;;  %v764_v13 = vld [vmem:[#allocation6 + $0x128] sm:$0xff] }
  0x71   : > { %1770 = vmatpush1.bf16.msra.mxu0 %v1769_v12  ;;  %v565_v11 = vld [vmem:[%s2431_s27 + $0x2] sm:$0xff]  ;;  %v1789_v12 = vpack.c.bf16 %v798_v4, %v796_v3  ;;  %v800_v16 = vld [vmem:[#allocation6 + $0x220] sm:$0xff]  ;;  %v805_v18 = vld [vmem:[#allocation6 + $0x248] sm:$0xff]  ;;  %v1885_v20 = vpack.c.bf16 %v761_v10, %v759_v9 }
  0x72   : > { %1772 = vmatprep.subr.bf16.mxu0 %v1771_v15  ;;  %v766_v14 = vld [vmem:[#allocation6 + $0x138] sm:$0xff]  ;;  %v1791_v15 = vpack.c.bf16 %v803_v6, %v801_v5  ;;  %v802_v17 = vld [vmem:[#allocation6 + $0x230] sm:$0xff]  ;;  %v763_v22 = vld [vmem:[#allocation6 + $0x120] sm:$0xff] }
  0x73   : > { %1874 = vmatpush1.bf16.msra.mxu1 %v1873_v46  ;;  %v807_v19 = vld [vmem:[#allocation6 + $0x258] sm:$0xff]  ;;  %v1887_v21 = vpack.c.bf16 %v766_v14, %v764_v13  ;;  %v765_v23 = vld [vmem:[#allocation6 + $0x130] sm:$0xff]  ;;  %v768_v26 = vld [vmem:[#allocation6 + $0x148] sm:$0xff] }
  0x74   : > { %1686 = vmatmul.mubr.msk.f32.vlgmr.msra.gmra.mrb[0].mxu0 %vm398_vm0, %v361_v24  ;;  %1876 = vmatprep.subr.bf16.mxu1 %v1875_v47  ;;  %v566_v24 = vld [vmem:[%s2431_s27 + $0xa] sm:$0xff]  ;;  %v806_v30 = vld [vmem:[#allocation6 + $0x250] sm:$0xff]  ;;  %v809_v31 = vld [vmem:[#allocation6 + $0x268] sm:$0xff]  ;;  %v1889_v33 = vpack.c.bf16 %v765_v23, %v763_v22 }
  0x75   : > { %1774 = vmatpush1.bf16.msra.mxu0 %v1773_v25  ;;  %558 = vmatprep.mubr.f32.mxu0 %v2249_v0  ;;  %v1793_v25 = vpack.c.bf16 %v802_v17, %v800_v16  ;;  %v770_v27 = vld [vmem:[#allocation6 + $0x158] sm:$0xff]  ;;  %v804_v29 = vld [vmem:[#allocation6 + $0x240] sm:$0xff]  ;;  %v769_v36 = vld [vmem:[#allocation6 + $0x150] sm:$0xff] }
  0x76   : > { %1776 = vmatprep.subr.bf16.mxu0 %v1775_v28  ;;  %v1795_v28 = vpack.c.bf16 %v807_v19, %v805_v18  ;;  %v811_v32 = vld [vmem:[#allocation6 + $0x278] sm:$0xff]  ;;  %v1891_v34 = vpack.c.bf16 %v770_v27, %v768_v26  ;;  %v767_v35 = vld [vmem:[#allocation6 + $0x140] sm:$0xff]  ;;  %v810_v42 = vld [vmem:[#allocation6 + $0x270] sm:$0xff] }
  0x77   : > { %1878 = vmatpush1.bf16.msra.mxu1 %v1877_v58  ;;  %v774_v39 = vld [vmem:[#allocation6 + $0x178] sm:$0xff]  ;;  %v1799_v40 = vpack.c.bf16 %v811_v32, %v809_v31  ;;  %v813_v43 = vld [vmem:[#allocation6 + $0x288] sm:$0xff]  ;;  %v1893_v45 = vpack.c.bf16 %v769_v36, %v767_v35  ;;  %v771_v47 = vld [vmem:[#allocation6 + $0x160] sm:$0xff] }
  0x78   : > { %1687 = vmatmul.mubr.msk.f32.gmra.mrb[2].mxu0 %vm398_vm0, %v362_v38  ;;  %1880 = vmatprep.subr.bf16.mxu1 %v1879_v59  ;;  %v772_v38 = vld [vmem:[#allocation6 + $0x168] sm:$0xff]  ;;  %v815_v44 = vld [vmem:[#allocation6 + $0x298] sm:$0xff]  ;;  %v773_v48 = vld [vmem:[#allocation6 + $0x170] sm:$0xff] }
  0x79   : > { %1778 = vmatpush1.bf16.msra.mxu0 %v1777_v37  ;;  %654 = vmatprep.mubr.f32.mxu0 %v2249_v0  ;;  %v1797_v37 = vpack.c.bf16 %v806_v30, %v804_v29  ;;  %v1895_v46 = vpack.c.bf16 %v774_v39, %v772_v38  ;;  %v812_v51 = vld [vmem:[#allocation6 + $0x280] sm:$0xff]  ;;  %v814_v52 = vld [vmem:[#allocation6 + $0x290] sm:$0xff]  ;;  %v819_v54 = vld [vmem:[#allocation6 + $0x2b8] sm:$0xff]  ;;  %v1897_v55 = vpack.c.bf16 %v773_v48, %v771_v47 }
  0x7a   : > { %1780 = vmatprep.subr.bf16.mxu0 %v1779_v41  ;;  %v808_v41 = vld [vmem:[#allocation6 + $0x260] sm:$0xff]  ;;  %v1805_v56 = vpack.c.bf16 %v814_v52, %v812_v51  ;;  %v818_v59 = vld [vmem:[#allocation6 + $0x2b0] sm:$0xff]  ;;  %v821_v60 = vld [vmem:[#allocation6 + $0x2c8] sm:$0xff] }
  0x7b   : > { %1882 = vmatpush1.bf16.msra.mxu1 %v1881_v7  ;;  %v1801_v49 = vpack.c.bf16 %v810_v42, %v808_v41  ;;  %v816_v58 = vld [vmem:[#allocation6 + $0x2a0] sm:$0xff]  ;;  %v823_v61 = vld [vmem:[#allocation6 + $0x2d8] sm:$0xff]  ;;  %v825_v3 = vld [vmem:[#allocation6 + $0x2e8] sm:$0xff] }
  0x7c   : > { %1884 = vmatprep.subr.bf16.mxu1 %v1883_v8  ;;  %v1811_v63 = vpack.c.bf16 %v823_v61, %v821_v60  ;;  %v820_v1 = vld [vmem:[#allocation6 + $0x2c0] sm:$0xff]  ;;  %v827_v4 = vld [vmem:[#allocation6 + $0x2f8] sm:$0xff]  ;;  %v826_v8 = vld [vmem:[#allocation6 + $0x2f0] sm:$0xff] }
  0x7d   : > { %1782 = vmatpush1.bf16.msra.mxu0 %v1781_v50  ;;  %v1803_v50 = vpack.c.bf16 %v815_v44, %v813_v43  ;;  %v1815_v6 = vpack.c.bf16 %v827_v4, %v825_v3  ;;  %v824_v7 = vld [vmem:[#allocation6 + $0x2e0] sm:$0xff]  ;;  %v829_v9 = vld [vmem:[#allocation6 + $0x308] sm:$0xff]  ;;  %v831_v10 = vld [vmem:[#allocation6 + $0x318] sm:$0xff] }
  0x7e   : > { %1784 = vmatprep.subr.bf16.mxu0 %v1783_v53  ;;  %v817_v53 = vld [vmem:[#allocation6 + $0x2a8] sm:$0xff]  ;;  %v828_v13 = vld [vmem:[#allocation6 + $0x300] sm:$0xff]  ;;  %v830_v14 = vld [vmem:[#allocation6 + $0x310] sm:$0xff] }
  0x7f   : > { %1886 = vmatpush1.bf16.msra.mxu1 %v1885_v20  ;;  %v1807_v57 = vpack.c.bf16 %v819_v54, %v817_v53  ;;  %v835_v16 = vld [vmem:[#allocation6 + $0x338] sm:$0xff]  ;;  %v1821_v17 = vpack.c.bf16 %v830_v14, %v828_v13  ;;  %v832_v19 = vld [vmem:[#allocation6 + $0x320] sm:$0xff]  ;;  %v834_v20 = vld [vmem:[#allocation6 + $0x330] sm:$0xff] }
  0x80   : > { %1888 = vmatprep.subr.bf16.mxu1 %v1887_v21  ;;  %v1825_v21 = vpack.c.bf16 %v834_v20, %v832_v19  ;;  %v837_v22 = vld [vmem:[#allocation6 + $0x348] sm:$0xff]  ;;  %v839_v23 = vld [vmem:[#allocation6 + $0x358] sm:$0xff]  ;;  %v838_v26 = vld [vmem:[#allocation6 + $0x350] sm:$0xff] }
  0x81   : > { %1786 = vmatpush1.bf16.msra.mxu0 %v1785_v62  ;;  %v1809_v62 = vpack.c.bf16 %v818_v59, %v816_v58  ;;  %v778_v29 = vld [vmem:[#allocation6 + $0x198] sm:$0xff]  ;;  %v841_v30 = vld [vmem:[#allocation6 + $0x368] sm:$0xff]  ;;  %v775_v32 = vld [vmem:[#allocation6 + $0x180] sm:$0xff] }
  0x82   : > { %1788 = vmatprep.subr.bf16.mxu0 %v1787_v2  ;;  %v822_v2 = vld [vmem:[#allocation6 + $0x2d0] sm:$0xff]  ;;  %v843_v35 = vld [vmem:[#allocation6 + $0x378] sm:$0xff]  ;;  %v840_v36 = vld [vmem:[#allocation6 + $0x360] sm:$0xff] }
  0x83   : > { %1890 = vmatpush1.bf16.msra.mxu1 %v1889_v33  ;;  %v1813_v5 = vpack.c.bf16 %v822_v2, %v820_v1  ;;  %v777_v33 = vld [vmem:[#allocation6 + $0x190] sm:$0xff]  ;;  %v1831_v38 = vpack.c.bf16 %v843_v35, %v841_v30  ;;  %v780_v41 = vld [vmem:[#allocation6 + $0x1a8] sm:$0xff]  ;;  %v782_v42 = vld [vmem:[#allocation6 + $0x1b8] sm:$0xff] }
  0x84   : > { %1688 = vmatmul.mubr.msk.f32.vlgmr.msra.gmra.mrb[0].mxu0 %vm398_vm0, %v565_v11  ;;  %1892 = vmatprep.subr.bf16.mxu1 %v1891_v34  ;;  %v1817_v11 = vpack.c.bf16 %v826_v8, %v824_v7  ;;  %v1901_v34 = vpack.c.bf16 %v777_v33, %v775_v32  ;;  %v845_v43 = vld [vmem:[#allocation6 + $0x388] sm:$0xff]  ;;  %v1903_v44 = vpack.c.bf16 %v782_v42, %v780_v41  ;;  %v847_v47 = vld [vmem:[#allocation6 + $0x398] sm:$0xff]  ;;  %v846_v51 = vld [vmem:[#allocation6 + $0x390] sm:$0xff] }
  0x85   : > { %660 = vmatprep.mubr.f32.mxu0 %v2249_v0  ;;  %1790 = vmatpush1.bf16.msra.mxu0 %v1789_v12  ;;  %v1819_v12 = vpack.c.bf16 %v831_v10, %v829_v9  ;;  %v784_v53 = vld [vmem:[#allocation6 + $0x1c8] sm:$0xff]  ;;  %v786_v54 = vld [vmem:[#allocation6 + $0x1d8] sm:$0xff]  ;;  %v785_v58 = vld [vmem:[#allocation6 + $0x1d0] sm:$0xff] }
  0x86   : > { %1792 = vmatprep.subr.bf16.mxu0 %v1791_v15  ;;  %v833_v15 = vld [vmem:[#allocation6 + $0x328] sm:$0xff]  ;;  %v851_v59 = vld [vmem:[#allocation6 + $0x3b8] sm:$0xff]  ;;  %v789_v7 = vld [vmem:[#allocation6 + $0x1f0] sm:$0xff] }
  0x87   : > { %1894 = vmatpush1.bf16.msra.mxu1 %v1893_v45  ;;  %v1823_v18 = vpack.c.bf16 %v835_v16, %v833_v15  ;;  %v779_v45 = vld [vmem:[#allocation6 + $0x1a0] sm:$0xff]  ;;  %v788_v2 = vld [vmem:[#allocation6 + $0x1e8] sm:$0xff]  ;;  %v790_v3 = vld [vmem:[#allocation6 + $0x1f8] sm:$0xff] }
  0x88   : > { %1689 = vmatmul.mubr.msk.f32.gmra.mrb[2].mxu0 %vm398_vm0, %v566_v24  ;;  %1896 = vmatprep.subr.bf16.mxu1 %v1895_v46  ;;  %v1827_v24 = vpack.c.bf16 %v839_v23, %v837_v22  ;;  %v781_v46 = vld [vmem:[#allocation6 + $0x1b0] sm:$0xff]  ;;  %v853_v4 = vld [vmem:[#allocation6 + $0x3c8] sm:$0xff]  ;;  %v855_v8 = vld [vmem:[#allocation6 + $0x3d8] sm:$0xff] }
  0x89   : > { %1794 = vmatpush1.bf16.msra.mxu0 %v1793_v25  ;;  %v836_v25 = vld [vmem:[#allocation6 + $0x340] sm:$0xff]  ;;  %v1905_v48 = vpack.c.bf16 %v781_v46, %v779_v45  ;;  %v1843_v10 = vpack.c.bf16 %v855_v8, %v853_v4  ;;  %v1041_v14 = vld [vmem:[#allocation6 + $0x408] sm:$0xff]  ;;  %v1043_v15 = vld [vmem:[#allocation6 + $0x418] sm:$0xff] }
  0x8a   : > { %1796 = vmatprep.subr.bf16.mxu0 %v1795_v28  ;;  %v1829_v27 = vpack.c.bf16 %v838_v26, %v836_v25  ;;  %v776_v28 = vld [vmem:[#allocation6 + $0x188] sm:$0xff]  ;;  %v1915_v16 = vpack.c.bf16 %v1043_v15, %v1041_v14  ;;  %v856_v19 = vld [vmem:[#allocation6 + $0x3e0] sm:$0xff]  ;;  %v858_v20 = vld [vmem:[#allocation6 + $0x3f0] sm:$0xff] }
  0x8b   : > { %1898 = vmatpush1.bf16.msra.mxu1 %v1897_v55  ;;  %v1899_v31 = vpack.c.bf16 %v778_v29, %v776_v28  ;;  %v849_v55 = vld [vmem:[#allocation6 + $0x3a8] sm:$0xff]  ;;  %v1849_v22 = vpack.c.bf16 %v858_v20, %v856_v19  ;;  %v671_v25 = vld [vmem:[%s2723_s2] sm:$0x3]  ;;  %v1040_v46 = vld [vmem:[#allocation6 + $0x400] sm:$0xff] }
  0x8c   : > { %v1839_v61 = vpack.c.bf16 %v851_v59, %v849_v55  ;;  %v1053_v15 = vld [vmem:[#allocation6 + $0x468] sm:$0xff] }
  0x8d   : > { %1798 = vmatpush1.bf16.msra.mxu0 %v1797_v37  ;;  %v842_v37 = vld [vmem:[#allocation6 + $0x370] sm:$0xff]  ;;  %1900 = vmatprep.subr.bf16.mxu1 %v1899_v31 }
  0x8e   : > { %1800 = vmatprep.subr.bf16.mxu0 %v1799_v40  ;;  %v1833_v39 = vpack.c.bf16 %v842_v37, %v840_v36  ;;  %v673_v40 = vlaneseq }
  0x8f   : > { %1902 = vmatpush1.bf16.msra.mxu1 %v1901_v34 }
  0x90   : > { %vm693_vm1 = vcmp.lt.s32.totalorder %v673_v40, 256  ;;  %1904 = vmatprep.subr.bf16.mxu1 %v1903_v44  ;;  %v674_v23 = vshrl.u32 %v673_v40, 7 }
  0x91   : > { %1802 = vmatpush1.bf16.msra.mxu0 %v1801_v49  ;;  %v1835_v49 = vpack.c.bf16 %v847_v47, %v845_v43  ;;  %695 = vst.msk [vmem:[#allocation2] ss:$8 sm:$0x3] %vm693_vm1, %v2249_v0  ;;  %698 = vst.msk [vmem:[#allocation2 + $0x21] ss:$8 sm:$0x3] %vm693_vm1, %v2249_v0 }
  0x92   : > { %1804 = vmatprep.subr.bf16.mxu0 %v1803_v50  ;;  %v844_v50 = vld [vmem:[#allocation6 + $0x380] sm:$0xff]  ;;  %v2459_v26 = vsub.s32 1, %v674_v23  ;;  %v1042_v47 = vld [vmem:[#allocation6 + $0x410] sm:$0xff] }
  0x93   : > { %v1837_v52 = vpack.c.bf16 %v846_v51, %v844_v50  ;;  %1906 = vmatpush1.bf16.msra.mxu1 %v1905_v48  ;;  %v1047_v50 = vld [vmem:[#allocation6 + $0x438] sm:$0xff]  ;;  %v1917_v51 = vpack.c.bf16 %v1042_v47, %v1040_v46 }
  0x94   : > { %v680_v28 = vrot.slane %v671_v25, %v2459_v26  ;;  %v1071_v46 = vld [vmem:[#allocation6 + $0x4f8] sm:$0xff] }
  0x95   : > { %1806 = vmatpush1.bf16.msra.mxu0 %v1805_v56  ;;  %v1907_v56 = vpack.c.bf16 %v786_v54, %v784_v53  ;;  %v1046_v53 = vld [vmem:[#allocation6 + $0x430] sm:$0xff] }
  0x96   : > { %1808 = vmatprep.subr.bf16.mxu0 %v1807_v57  ;;  %v783_v57 = vld [vmem:[#allocation6 + $0x1c0] sm:$0xff] }
  0x97   : > { %v1909_v60 = vpack.c.bf16 %v785_v58, %v783_v57  ;;  %1908 = vmatprep.subr.bf16.mxu1 %v1907_v56 }
  0x99   : > { %1810 = vmatpush1.bf16.msra.mxu0 %v1809_v62  ;;  %v848_v62 = vld [vmem:[#allocation6 + $0x3a0] sm:$0xff]  ;;  %1910 = vmatpush1.bf16.msra.mxu1 %v1909_v60 }
  0x9a   : > { %1812 = vmatprep.subr.bf16.mxu0 %v1811_v63  ;;  %v850_v63 = vld [vmem:[#allocation6 + $0x3b0] sm:$0xff] }
  0x9b   : > { %v1841_v1 = vpack.c.bf16 %v850_v63, %v848_v62  ;;  %v1049_v63 = vld [vmem:[#allocation6 + $0x448] sm:$0xff] }
  0x9d   : > { %1814 = vmatpush1.bf16.msra.mxu0 %v1813_v5  ;;  %v1911_v5 = vpack.c.bf16 %v790_v3, %v788_v2 }
  0x9e   : > { %1816 = vmatprep.subr.bf16.mxu0 %v1815_v6  ;;  %v787_v6 = vld [vmem:[#allocation6 + $0x1e0] sm:$0xff] }
  0x9f   : > { %v1913_v9 = vpack.c.bf16 %v789_v7, %v787_v6  ;;  %1912 = vmatprep.subr.bf16.mxu1 %v1911_v5 }
  0xa1   : > { %1818 = vmatpush1.bf16.msra.mxu0 %v1817_v11  ;;  %v852_v11 = vld [vmem:[#allocation6 + $0x3c0] sm:$0xff]  ;;  %1914 = vmatpush1.bf16.msra.mxu1 %v1913_v9 }
  0xa2   : > { %1820 = vmatprep.subr.bf16.mxu0 %v1819_v12  ;;  %v854_v12 = vld [vmem:[#allocation6 + $0x3d0] sm:$0xff]  ;;  %1916 = vmatprep.subr.bf16.mxu1 %v1915_v16  ;;  %v1055_v16 = vld [vmem:[#allocation6 + $0x478] sm:$0xff] }
  0xa3   : > { %v1845_v13 = vpack.c.bf16 %v854_v12, %v852_v11  ;;  %v1050_v11 = vld [vmem:[#allocation6 + $0x450] sm:$0xff]  ;;  %v1927_v20 = vpack.c.bf16 %v1055_v16, %v1053_v15  ;;  %v1091_v15 = vld [vmem:[#allocation6 + $0x598] sm:$0xff] }
  0xa5   : > { %1822 = vmatpush1.bf16.msra.mxu0 %v1821_v17  ;;  %v857_v17 = vld [vmem:[#allocation6 + $0x3e8] sm:$0xff] }
  0xa6   : > { %1824 = vmatprep.subr.bf16.mxu0 %v1823_v18  ;;  %v859_v18 = vld [vmem:[#allocation6 + $0x3f8] sm:$0xff] }
  0xa9   : > { %1826 = vmatpush1.bf16.msra.mxu0 %v1825_v21  ;;  %v1847_v21 = vpack.c.bf16 %v859_v18, %v857_v17 }
  0xaa   : > { %1828 = vmatprep.subr.bf16.mxu0 %v1827_v24  ;;  %v2454_v24 = vsub.s32 0, %v674_v23  ;;  %v1054_v23 = vld [vmem:[#allocation6 + $0x470] sm:$0xff] }
  0xad   : > { %1830 = vmatpush1.bf16.msra.mxu0 %v1829_v27  ;;  %v676_v27 = vrot.slane %v671_v25, %v2454_v24  ;;  %v1057_v25 = vld [vmem:[#allocation6 + $0x488] sm:$0xff] }
  0xae   : > { %1832 = vmatprep.subr.bf16.mxu0 %v1831_v38 }
  0xb1   : > { %1834 = vmatpush1.bf16.msra.mxu0 %v1833_v39 }
  0xb2   : > { %1836 = vmatprep.subr.bf16.mxu0 %v1835_v49  ;;  %v1045_v49 = vld [vmem:[#allocation6 + $0x428] sm:$0xff] }
  0xb3   : > { %v1919_v56 = vpack.c.bf16 %v1047_v50, %v1045_v49  ;;  %v1068_v50 = vld [vmem:[#allocation6 + $0x4e0] sm:$0xff] }
  0xb5   : > { %1838 = vmatpush1.bf16.msra.mxu0 %v1837_v52  ;;  %v1044_v52 = vld [vmem:[#allocation6 + $0x420] sm:$0xff] }
  0xb6   : > { %1840 = vmatprep.subr.bf16.mxu0 %v1839_v61  ;;  %v1921_v4 = vpack.c.bf16 %v1046_v53, %v1044_v52  ;;  %v1073_v52 = vld [vmem:[#allocation6 + $0x508] sm:$0xff]  ;;  %v1075_v53 = vld [vmem:[#allocation6 + $0x518] sm:$0xff] }
  0xb9   : > { %1842 = vmatpush1.bf16.msra.mxu0 %v1841_v1  ;;  %v1051_v1 = vld [vmem:[#allocation6 + $0x458] sm:$0xff] }
  0xba   : > { %1844 = vmatprep.subr.bf16.mxu0 %v1843_v10  ;;  %v1923_v8 = vpack.c.bf16 %v1051_v1, %v1049_v63  ;;  %v1048_v10 = vld [vmem:[#allocation6 + $0x440] sm:$0xff]  ;;  %v1078_v63 = vld [vmem:[#allocation6 + $0x530] sm:$0xff]  ;;  %v1081_v1 = vld [vmem:[#allocation6 + $0x548] sm:$0xff] }
  0xbb   : > { %v1925_v18 = vpack.c.bf16 %v1050_v11, %v1048_v10 }
  0xbd   : > { %1846 = vmatpush1.bf16.msra.mxu0 %v1845_v13 }
  0xbe   : > { %1848 = vmatprep.subr.bf16.mxu0 %v1847_v21 }
  0xc1   : > { %1850 = vmatpush1.bf16.msra.mxu0 %v1849_v22  ;;  %v1052_v22 = vld [vmem:[#allocation6 + $0x460] sm:$0xff] }
 0x157   : > { %v656_v29 = vpop.f32.mrb[0].mxu0 }
 0x158   : > { %v683_v30 = vadd.f32 %v676_v27, %v656_v29  ;;  %v658_v31 = vpop.f32.mrb[1].mxu0 }
 0x159   : > { %v684_v32 = vadd.f32 %v680_v28, %v658_v31  ;;  %v1058_v31 = vld [vmem:[#allocation6 + $0x490] sm:$0xff] }
 0x15a   : > { %v687_v33 = vmax.f32 %v683_v30, 0.0  ;;  %v1056_v30 = vld [vmem:[#allocation6 + $0x480] sm:$0xff] }
 0x15b   : > { %v688_v34 = vmax.f32 %v684_v32, 0.0  ;;  %v662_v35 = vpop.f32.mrb[2].mxu0  ;;  %v1061_v32 = vld [vmem:[#allocation6 + $0x4a8] sm:$0xff] }
 0x15c   : > { %v705_v36 = vrot.slane %v687_v33, 7  ;;  %v685_v37 = vadd.f32 %v676_v27, %v662_v35  ;;  %v664_v38 = vpop.f32.mrb[3].mxu0  ;;  %v1059_v27 = vld [vmem:[#allocation6 + $0x498] sm:$0xff] }
 0x15d   : > { %v706_v39 = vrot.slane %v688_v34, 7  ;;  %v686_v40 = vadd.f32 %v680_v28, %v664_v38  ;;  %v1929_v28 = vpack.c.bf16 %v1054_v23, %v1052_v22  ;;  %v1931_v29 = vpack.c.bf16 %v1059_v27, %v1057_v25  ;;  %v1063_v33 = vld [vmem:[#allocation6 + $0x4b8] sm:$0xff]  ;;  %v1065_v38 = vld [vmem:[#allocation6 + $0x4c8] sm:$0xff]  ;;  %v1092_v25 = vld [vmem:[#allocation6 + $0x5a0] sm:$0xff] }
 0x15e   : > { %717 = vst [vmem:[#allocation2] sm:$0xfe] %v705_v36  ;;  %v689_v41 = vmax.f32 %v685_v37, 0.0  ;;  %v1933_v34 = vpack.c.bf16 %v1058_v31, %v1056_v30  ;;  %v1935_v35 = vpack.c.bf16 %v1063_v33, %v1061_v32  ;;  %v1062_v37 = vld [vmem:[#allocation6 + $0x4b0] sm:$0xff]  ;;  %v1096_v32 = vld [vmem:[#allocation6 + $0x5c0] sm:$0xff] }
 0x15f   : > { %718 = vst [vmem:[#allocation2 + $0x8] sm:$0xfe] %v706_v39  ;;  %v690_v42 = vmax.f32 %v686_v40, 0.0  ;;  %v1094_v27 = vld [vmem:[#allocation6 + $0x5b0] sm:$0xff] }
 0x160   : > { %v707_v43 = vrot.slane %v689_v41, 7  ;;  %v1969_v30 = vpack.c.bf16 %v1094_v27, %v1092_v25  ;;  %v1098_v33 = vld [vmem:[#allocation6 + $0x5d0] sm:$0xff]  ;;  %v1263_v27 = vld [vmem:[%s2726_s5 + $0xe8] sm:$0xff] }
 0x161   : > { %v709_v44 = vrot.slane %v690_v42, 7  ;;  %v1064_v42 = vld [vmem:[#allocation6 + $0x4c0] sm:$0xff]  ;;  %v1262_v25 = vld [vmem:[%s2726_s5 + $0xe0] sm:$0xff] }
 0x162   : > { %v2463_v45 = vsel %vm704_vm2, %v705_v36, %v707_v43  ;;  %721 = vst [vmem:[#allocation2 + $0x20] sm:$0x1] %v707_v43  ;;  %v1060_v36 = vld [vmem:[#allocation6 + $0x4a0] sm:$0xff]  ;;  %v1066_v43 = vld [vmem:[#allocation6 + $0x4d0] sm:$0xff] }
 0x163   : > { %v2465_v48 = vsel %vm704_vm2, %v706_v39, %v709_v44  ;;  %722 = vst [vmem:[#allocation2 + $0x28] sm:$0x1] %v709_v44  ;;  %v868_v2 = vrot.slane %v2463_v45, 1  ;;  %v1067_v39 = vld [vmem:[#allocation6 + $0x4d8] sm:$0xff]  ;;  %v1937_v40 = vpack.c.bf16 %v1062_v37, %v1060_v36  ;;  %v1069_v44 = vld [vmem:[#allocation6 + $0x4e8] sm:$0xff]  ;;  %v1941_v47 = vpack.c.bf16 %v1066_v43, %v1064_v42 }
 0x164   : > { %v871_v61 = vrot.slane %v2465_v48, 1  ;;  %v1113_v7 = vrot.slane %v2465_v48, 2  ;;  %v1939_v41 = vpack.c.bf16 %v1067_v39, %v1065_v38  ;;  %v1943_v49 = vpack.c.bf16 %v1071_v46, %v1069_v44  ;;  %v1100_v38 = vld [vmem:[#allocation6 + $0x5e0] sm:$0xff]  ;;  %v1102_v39 = vld [vmem:[#allocation6 + $0x5f0] sm:$0xff] }
 0x165   : > { %v791_v54 = vld [vmem:[#allocation2] sm:$0xfe]  ;;  %v1973_v36 = vpack.c.bf16 %v1098_v33, %v1096_v32  ;;  %v1264_v32 = vld [vmem:[%s2726_s5 + $0xf0] sm:$0xff]  ;;  %v1265_v33 = vld [vmem:[%s2726_s5 + $0xf8] sm:$0xff] }
 0x166   : > { %v724_v55 = vld [vmem:[#allocation2 + $0x8] sm:$0xff]  ;;  %v867_v59 = vrot.slane %v791_v54, 1  ;;  %v723_v60 = vld [vmem:[#allocation2] sm:$0xff] }
 0x167   : > { %v792_v57 = vld [vmem:[#allocation2 + $0x8] sm:$0xfe]  ;;  %1022 = vmatprep.mubr.f32.mxu1 %v724_v55  ;;  %v1947_v55 = vpack.c.bf16 %v1075_v53, %v1073_v52  ;;  %v1250_v53 = vld [vmem:[%s2726_s5 + $0x80] sm:$0xff] }
 0x168   : > { %v1036_v58 = vld [vmem:[#allocation2 + $0x8] sm:$0xfc]  ;;  %v870_v62 = vrot.slane %v792_v57, 1  ;;  %1023 = vmatmul.mubr.f32.vlgmr.msra.gmra.mrb[0].mxu1 %v723_v60  ;;  %v869_v9 = vsel %vm866_vm3, %v867_v59, %v868_v2  ;;  %v1074_v57 = vld [vmem:[#allocation6 + $0x510] sm:$0xff] }
 0x169   : > { %v1112_v3 = vrot.slane %v1036_v58, 2  ;;  %1918 = vmatpush1.bf16.msra.mxu1 %v1917_v51  ;;  %1028 = vmatprep.mubr.f32.mxu1 %v2465_v48  ;;  %v793_v6 = vld [vmem:[#allocation2 + $0x20] sm:$0x1]  ;;  %v1077_v58 = vld [vmem:[#allocation6 + $0x528] sm:$0xff]  ;;  %v1079_v59 = vld [vmem:[#allocation6 + $0x538] sm:$0xff] }
 0x16a   : > { %v872_v5 = vsel %vm866_vm3, %v870_v62, %v871_v61  ;;  %1920 = vmatprep.subr.bf16.mxu1 %v1919_v56  ;;  %v794_v12 = vld [vmem:[#allocation2 + $0x28] sm:$0x1]  ;;  %v873_v13 = vrot.slane %v793_v6, 1  ;;  %v1070_v51 = vld [vmem:[#allocation6 + $0x4f0] sm:$0xff]  ;;  %v1072_v56 = vld [vmem:[#allocation6 + $0x500] sm:$0xff] }
 0x16b   : > { %945 = vmatprep.mubr.f32.mxu0 %v872_v5  ;;  %v875_v14 = vrot.slane %v794_v12, 1  ;;  %v1114_v17 = vsel %vm1108_vm4, %v1112_v3, %v1113_v7  ;;  %v1945_v54 = vpack.c.bf16 %v1070_v51, %v1068_v50  ;;  %v1949_v60 = vpack.c.bf16 %v1074_v57, %v1072_v56  ;;  %v1076_v62 = vld [vmem:[#allocation6 + $0x520] sm:$0xff]  ;;  %v1082_v6 = vld [vmem:[#allocation6 + $0x550] sm:$0xff]  ;;  %v1038_v42 = vld [vmem:[#allocation2 + $0x28] sm:$0x3] }
 0x16c   : > { %946 = vmatmul.mubr.f32.vlgmr.msra.gmra.mrb[4].mxu0 %v869_v9  ;;  %1029 = vmatmul.mubr.f32.gmra.mrb[2].mxu1 %v2463_v45  ;;  %v874_v21 = vsel %vm866_vm3, %v868_v2, %v873_v13  ;;  %v1083_v2 = vld [vmem:[#allocation6 + $0x558] sm:$0xff]  ;;  %v1953_v3 = vpack.c.bf16 %v1078_v63, %v1076_v62  ;;  %v1080_v5 = vld [vmem:[#allocation6 + $0x540] sm:$0xff]  ;;  %v1086_v13 = vld [vmem:[#allocation6 + $0x570] sm:$0xff]  ;;  %v1117_v44 = vrot.slane %v1038_v42, 2 }
 0x16d   : > { %1922 = vmatpush1.bf16.msra.mxu1 %v1921_v4  ;;  %1187 = vmatprep.mubr.f32.mxu1 %v1114_v17  ;;  %v876_v19 = vsel %vm866_vm3, %v871_v61, %v875_v14  ;;  %v1951_v61 = vpack.c.bf16 %v1079_v59, %v1077_v58  ;;  %v1955_v4 = vpack.c.bf16 %v1083_v2, %v1081_v1  ;;  %v1087_v9 = vld [vmem:[#allocation6 + $0x578] sm:$0xff]  ;;  %v1084_v12 = vld [vmem:[#allocation6 + $0x560] sm:$0xff]  ;;  %v1089_v14 = vld [vmem:[#allocation6 + $0x588] sm:$0xff] }
 0x16e   : > { %1924 = vmatprep.subr.bf16.mxu1 %v1923_v8  ;;  %951 = vmatprep.mubr.f32.mxu0 %v876_v19  ;;  %v1085_v8 = vld [vmem:[#allocation6 + $0x568] sm:$0xff]  ;;  %v1957_v10 = vpack.c.bf16 %v1082_v6, %v1080_v5  ;;  %v1961_v16 = vpack.c.bf16 %v1086_v13, %v1084_v12  ;;  %v1963_v17 = vpack.c.bf16 %v1091_v15, %v1089_v14  ;;  %v1090_v19 = vld [vmem:[#allocation6 + $0x590] sm:$0xff]  ;;  %v1236_v59 = vld [vmem:[%s2726_s5 + $0x10] sm:$0xff] }
 0x16f   : > { %v1959_v11 = vpack.c.bf16 %v1087_v9, %v1085_v8  ;;  %v1037_v46 = vld [vmem:[#allocation2 + $0x20] sm:$0x3]  ;;  %v1118_v51 = vsel %vm1108_vm4, %v1113_v7, %v1117_v44  ;;  %v1235_v7 = vld [vmem:[%s2726_s5 + $0x8] sm:$0xff]  ;;  %v1253_v56 = vld [vmem:[%s2726_s5 + $0x98] sm:$0xff] }
 0x170   : > { %952 = vmatmul.mubr.f32.gmra.mrb[6].mxu0 %v874_v21  ;;  %v1095_v21 = vld [vmem:[#allocation6 + $0x5b8] sm:$0xff]  ;;  %v1115_v50 = vrot.slane %v1037_v46, 2  ;;  %v1234_v48 = vld [vmem:[%s2726_s5] sm:$0xff]  ;;  %v1256_v5 = vld [vmem:[%s2726_s5 + $0xb0] sm:$0xff] }
 0x171   : > { %1926 = vmatpush1.bf16.msra.mxu1 %v1925_v18  ;;  %v1088_v18 = vld [vmem:[#allocation6 + $0x580] sm:$0xff]  ;;  %v1981_v57 = vpack.c.bf16 %v1235_v7, %v1234_v48  ;;  %v1254_v62 = vld [vmem:[%s2726_s5 + $0xa0] sm:$0xff]  ;;  %v1255_v63 = vld [vmem:[%s2726_s5 + $0xa8] sm:$0xff] }
 0x172   : > { %1928 = vmatprep.subr.bf16.mxu1 %v1927_v20  ;;  %v1093_v20 = vld [vmem:[#allocation6 + $0x5a8] sm:$0xff]  ;;  %v1965_v22 = vpack.c.bf16 %v1090_v19, %v1088_v18  ;;  %v1987_v1 = vpack.c.bf16 %v1255_v63, %v1254_v62  ;;  %v1238_v2 = vld [vmem:[%s2726_s5 + $0x20] sm:$0xff]  ;;  %v1240_v9 = vld [vmem:[%s2726_s5 + $0x30] sm:$0xff] }
 0x173   : > { %v1967_v23 = vpack.c.bf16 %v1095_v21, %v1093_v20  ;;  %v1257_v6 = vld [vmem:[%s2726_s5 + $0xb8] sm:$0xff]  ;;  %v1258_v12 = vld [vmem:[%s2726_s5 + $0xc0] sm:$0xff]  ;;  %v1259_v13 = vld [vmem:[%s2726_s5 + $0xc8] sm:$0xff] }
 0x174   : > { %v1991_v8 = vpack.c.bf16 %v1257_v6, %v1256_v5  ;;  %v1995_v14 = vpack.c.bf16 %v1259_v13, %v1258_v12  ;;  %v1242_v15 = vld [vmem:[%s2726_s5 + $0x40] sm:$0xff]  ;;  %v1260_v18 = vld [vmem:[%s2726_s5 + $0xd0] sm:$0xff]  ;;  %v1261_v19 = vld [vmem:[%s2726_s5 + $0xd8] sm:$0xff] }
 0x175   : > { %1930 = vmatpush1.bf16.msra.mxu1 %v1929_v28  ;;  %v1097_v28 = vld [vmem:[#allocation6 + $0x5c8] sm:$0xff]  ;;  %v1999_v20 = vpack.c.bf16 %v1261_v19, %v1260_v18  ;;  %v1244_v21 = vld [vmem:[%s2726_s5 + $0x50] sm:$0xff]  ;;  %v1453_v12 = vld [vmem:[%s2728_s7] sm:$0xff] }
 0x176   : > { %1932 = vmatprep.subr.bf16.mxu1 %v1931_v29  ;;  %v1099_v29 = vld [vmem:[#allocation6 + $0x5d8] sm:$0xff]  ;;  %v1457_v19 = vld [vmem:[%s2728_s7 + $0x20] sm:$0xff] }
 0x177   : > { %v1971_v31 = vpack.c.bf16 %v1099_v29, %v1097_v28  ;;  %v2003_v28 = vpack.c.bf16 %v1263_v27, %v1262_v25  ;;  %v1246_v29 = vld [vmem:[%s2726_s5 + $0x60] sm:$0xff] }
 0x178   : > { %v1461_v27 = vld [vmem:[%s2728_s7 + $0x40] sm:$0xff] }
 0x179   : > { %1934 = vmatpush1.bf16.msra.mxu1 %v1933_v34  ;;  %v1101_v34 = vld [vmem:[#allocation6 + $0x5e8] sm:$0xff] }
 0x17a   : > { %1936 = vmatprep.subr.bf16.mxu1 %v1935_v35  ;;  %v1103_v35 = vld [vmem:[#allocation6 + $0x5f8] sm:$0xff] }
 0x17b   : > { %v1975_v37 = vpack.c.bf16 %v1103_v35, %v1101_v34  ;;  %v2007_v34 = vpack.c.bf16 %v1265_v33, %v1264_v32  ;;  %v1248_v35 = vld [vmem:[%s2726_s5 + $0x70] sm:$0xff]  ;;  %v1465_v33 = vld [vmem:[%s2728_s7 + $0x60] sm:$0xff] }
 0x17d   : > { %1938 = vmatpush1.bf16.msra.mxu1 %v1937_v40  ;;  %v1035_v40 = vld [vmem:[#allocation2] sm:$0xfc] }
 0x17e   : > { %1940 = vmatprep.subr.bf16.mxu1 %v1939_v41  ;;  %v1977_v41 = vpack.c.bf16 %v1102_v39, %v1100_v38  ;;  %v1109_v43 = vrot.slane %v1035_v40, 2 }
 0x181   : > { %1942 = vmatpush1.bf16.msra.mxu1 %v1941_v47  ;;  %v1110_v47 = vrot.slane %v2463_v45, 2  ;;  %v1251_v45 = vld [vmem:[%s2726_s5 + $0x88] sm:$0xff] }
 0x182   : > { %1944 = vmatprep.subr.bf16.mxu1 %v1943_v49 }
 0x183   : > { %v1111_v49 = vsel %vm1108_vm4, %v1109_v43, %v1110_v47  ;;  %v1116_v52 = vsel %vm1108_vm4, %v1110_v47, %v1115_v50  ;;  %v1204_v43 = vld [vmem:[%s2725_s4] sm:$0x3] }
 0x184   : > { %v1213_v50 = vrot.slane %v1204_v43, %v2459_v26 }
 0x185   : > { %1946 = vmatpush1.bf16.msra.mxu1 %v1945_v54  ;;  %v1979_v54 = vpack.c.bf16 %v1251_v45, %v1250_v53 }
 0x186   : > { %1948 = vmatprep.subr.bf16.mxu1 %v1947_v55  ;;  %v1252_v55 = vld [vmem:[%s2726_s5 + $0x90] sm:$0xff] }
 0x187   : > { %v1983_v58 = vpack.c.bf16 %v1253_v56, %v1252_v55  ;;  %1980 = vmatprep.subr.bf16.mxu0 %v1979_v54 }
 0x188   : > { %1982 = vmatpush3.bf16.msra.mxu0 %v1981_v57 }
 0x189   : > { %1950 = vmatpush1.bf16.msra.mxu1 %v1949_v60  ;;  %v1237_v60 = vld [vmem:[%s2726_s5 + $0x18] sm:$0xff]  ;;  %1984 = vmatprep.subr.bf16.mxu0 %v1983_v58 }
 0x18a   : > { %1952 = vmatprep.subr.bf16.mxu1 %v1951_v61  ;;  %v1985_v61 = vpack.c.bf16 %v1237_v60, %v1236_v59 }
 0x18c   : > { %1986 = vmatpush3.bf16.msra.mxu0 %v1985_v61 }
 0x18d   : > { %1954 = vmatpush1.bf16.msra.mxu1 %v1953_v3  ;;  %v1239_v3 = vld [vmem:[%s2726_s5 + $0x28] sm:$0xff]  ;;  %1988 = vmatprep.subr.bf16.mxu0 %v1987_v1 }
 0x18e   : > { %1956 = vmatprep.subr.bf16.mxu1 %v1955_v4  ;;  %v1989_v4 = vpack.c.bf16 %v1239_v3, %v1238_v2 }
 0x190   : > { %1990 = vmatpush3.bf16.msra.mxu0 %v1989_v4 }
 0x191   : > { %1958 = vmatpush1.bf16.msra.mxu1 %v1957_v10  ;;  %v1241_v10 = vld [vmem:[%s2726_s5 + $0x38] sm:$0xff]  ;;  %1992 = vmatprep.subr.bf16.mxu0 %v1991_v8  ;;  %v1690_v8 = vld.sshfl [vmem:[%s2727_s6] sm:$0x33 pattern:$0x76325410] }
 0x192   : > { %1960 = vmatprep.subr.bf16.mxu1 %v1959_v11  ;;  %v1993_v11 = vpack.c.bf16 %v1241_v10, %v1240_v9  ;;  %v1346_v9 = vcombine.high %v1690_v8, %v1690_v8  ;;  %v1454_v10 = vld [vmem:[%s2728_s7 + $0x8] sm:$0xff] }
 0x194   : > { %1994 = vmatpush3.bf16.msra.mxu0 %v1993_v11  ;;  %v1456_v11 = vld [vmem:[%s2728_s7 + $0x18] sm:$0xff] }
 0x195   : > { %1962 = vmatpush1.bf16.msra.mxu1 %v1961_v16  ;;  %v1243_v16 = vld [vmem:[%s2726_s5 + $0x48] sm:$0xff]  ;;  %1996 = vmatprep.subr.bf16.mxu0 %v1995_v14  ;;  %v2011_v13 = vpack.c.bf16 %v1456_v11, %v1454_v10  ;;  %v1455_v14 = vld [vmem:[%s2728_s7 + $0x10] sm:$0xff] }
 0x196   : > { %1964 = vmatprep.subr.bf16.mxu1 %v1963_v17  ;;  %v1997_v17 = vpack.c.bf16 %v1243_v16, %v1242_v15  ;;  %v1458_v15 = vld [vmem:[%s2728_s7 + $0x28] sm:$0xff]  ;;  %v1460_v16 = vld [vmem:[%s2728_s7 + $0x38] sm:$0xff] }
 0x197   : > { %v2015_v18 = vpack.c.bf16 %v1460_v16, %v1458_v15 }
 0x198   : > { %1998 = vmatpush3.bf16.msra.mxu0 %v1997_v17  ;;  %v2013_v17 = vpack.c.bf16 %v1455_v14, %v1453_v12 }
 0x199   : > { %1966 = vmatpush1.bf16.msra.mxu1 %v1965_v22  ;;  %v1245_v22 = vld [vmem:[%s2726_s5 + $0x58] sm:$0xff]  ;;  %2000 = vmatprep.subr.bf16.mxu0 %v1999_v20  ;;  %v1459_v20 = vld [vmem:[%s2728_s7 + $0x30] sm:$0xff] }
 0x19a   : > { %1968 = vmatprep.subr.bf16.mxu1 %v1967_v23  ;;  %v2001_v23 = vpack.c.bf16 %v1245_v22, %v1244_v21  ;;  %v1462_v21 = vld [vmem:[%s2728_s7 + $0x48] sm:$0xff]  ;;  %v1464_v22 = vld [vmem:[%s2728_s7 + $0x58] sm:$0xff] }
 0x19b   : > { %v2019_v25 = vpack.c.bf16 %v1464_v22, %v1462_v21 }
 0x19c   : > { %2002 = vmatpush3.bf16.msra.mxu0 %v2001_v23  ;;  %v2017_v23 = vpack.c.bf16 %v1459_v20, %v1457_v19 }
 0x19d   : > { %1970 = vmatpush1.bf16.msra.mxu1 %v1969_v30  ;;  %v1247_v30 = vld [vmem:[%s2726_s5 + $0x68] sm:$0xff]  ;;  %2004 = vmatprep.subr.bf16.mxu0 %v2003_v28  ;;  %v1463_v28 = vld [vmem:[%s2728_s7 + $0x50] sm:$0xff] }
 0x19e   : > { %1972 = vmatprep.subr.bf16.mxu1 %v1971_v31  ;;  %v2005_v31 = vpack.c.bf16 %v1247_v30, %v1246_v29  ;;  %v1466_v29 = vld [vmem:[%s2728_s7 + $0x68] sm:$0xff]  ;;  %v1468_v30 = vld [vmem:[%s2728_s7 + $0x78] sm:$0xff] }
 0x19f   : > { %v2023_v32 = vpack.c.bf16 %v1468_v30, %v1466_v29 }
 0x1a0   : > { %2006 = vmatpush3.bf16.msra.mxu0 %v2005_v31  ;;  %v2021_v31 = vpack.c.bf16 %v1463_v28, %v1461_v27 }
 0x1a1   : > { %1974 = vmatpush1.bf16.msra.mxu1 %v1973_v36  ;;  %v1249_v36 = vld [vmem:[%s2726_s5 + $0x78] sm:$0xff]  ;;  %2008 = vmatprep.subr.bf16.mxu0 %v2007_v34  ;;  %v1467_v34 = vld [vmem:[%s2728_s7 + $0x70] sm:$0xff] }
 0x1a2   : > { %1976 = vmatprep.subr.bf16.mxu1 %v1975_v37  ;;  %v2009_v37 = vpack.c.bf16 %v1249_v36, %v1248_v35  ;;  %v2025_v35 = vpack.c.bf16 %v1467_v34, %v1465_v33  ;;  %v1451_v36 = vld [vmem:[%s2431_s27 + $0x1] sm:$0xff] }
 0x1a4   : > { %2010 = vmatpush3.bf16.msra.mxu0 %v2009_v37  ;;  %v1452_v37 = vld [vmem:[%s2431_s27 + $0x9] sm:$0xff]  ;;  %s353_s27 = sand.u32 1, %s2235_s10  }
 0x1a5   : > { %1978 = vmatpush1.bf16.msra.mxu1 %v1977_v41  ;;  %1691 = vmatprep.subr.msk.mxu0 %vm1351_vm5, %v1346_v9  ;;  %s1682_s25 = sshll.u32 %s353_s27, 5  ;;  %s2680_s13 = scalar_lea.sflag [#allocation5], %s353_s27 }
 0x1a6   : > { %2012 = vmatprep.subr.bf16.mxu1 %v2011_v13  ;;  %s355_s23 = scalar_lea.vmem [#allocation8], %s1682_s25 }
 0x1a7   : > { %s1590_s11 = sshll.u32 %s355_s23, 4  ;;  %s2671_s11 = int_to_ptr.vmem [resolvable:$true] %s1590_s11 }
 0x1a8   : > { %1188 = vmatmul.mubr.f32.vlgmr.msra.gmra.mrb[0].mxu1 %v1111_v49  ;;  %v1209_v49 = vrot.slane %v1204_v43, %v2454_v24  ;;  %s2173_s26 = scalar_lea.vmem %s2671_s11, 512  ;;  %p2180_p4 = scmp.lt.s32.totalorder %s2671_s11, %s2178_s29 }
 0x1a9   : > { %1193 = vmatprep.mubr.f32.mxu1 %v1118_v51  ;;  %2014 = vmatpush1.bf16.msra.mxu1 %v2013_v17  ;;  %p2174_p10 = scmp.ne.s32.totalorder %s2671_s11, %s2173_s26  ;;  %p2181_p7 = scmp.lt.s32.totalorder %s2179_s14, %s2173_s26 }
 0x1aa   : > { %2016 = vmatprep.subr.bf16.mxu1 %v2015_v18 }
 0x1ab   : > { %p2175_p2 = pnand %p2174_p10, %p2749_p1  ;;  %p2182_p8 = por %p2181_p7, %p2180_p4 }
 0x1ac   : > { %1194 = vmatmul.mubr.f32.gmra.mrb[2].mxu1 %v1116_v52 }
 0x1ad   : > { %1551 = vmatprep.mubr.f32.mxu1 %v2249_v0  ;;  %2018 = vmatpush1.bf16.msra.mxu1 %v2017_v23  ;;  %p2176_p3 = pneg %p2175_p2 }
 0x1ae   : > { %2020 = vmatprep.subr.bf16.mxu1 %v2019_v25 }
 0x1af   : > { %p2183_p11 = pnand %p2182_p8, %p2176_p3 }
 0x1b1   : > { %2022 = vmatpush1.bf16.msra.mxu1 %v2021_v31 }
 0x1b2   : > { %2024 = vmatprep.subr.bf16.mxu1 %v2023_v32 }
 0x1b5   : > { %2026 = vmatpush1.bf16.msra.mxu1 %v2025_v35 }
 0x1b8   : > { %1696 = vmatmul.mubr.msk.f32.vlgmr.msra.gmra.mrb[4].mxu1 %vm398_vm0, %v1451_v36 }
 0x1b9   : > { %1557 = vmatprep.mubr.f32.mxu1 %v2249_v0 }
 0x1bc   : > { %1697 = vmatmul.mubr.msk.f32.gmra.mrb[6].mxu1 %vm398_vm0, %v1452_v37 }
 0x23f   : > { %v947_v38 = vpop.f32.mrb[4].mxu0 }
 0x240   : > { %v949_v39 = vpop.f32.mrb[5].mxu0 }
 0x243   : > { %v953_v40 = vpop.f32.mrb[6].mxu0 }
 0x244   : > { %v955_v41 = vpop.f32.mrb[7].mxu0 }
 0x27b   : > { %v1189_v42 = vpop.f32.mrb[0].mxu1 }
 0x27c   : > { %v2027_v44 = vadd.f32 %v1189_v42, %v947_v38  ;;  %v1191_v46 = vpop.f32.mrb[1].mxu1 }
 0x27d   : > { %v2028_v47 = vadd.f32 %v1191_v46, %v949_v39 }
 0x27e   : > { %v2587_v48 = vadd.f32 %v2027_v44, %v1209_v49 }
 0x27f   : > { %v1195_v51 = vpop.f32.mrb[2].mxu1  ;;  %v2591_v7 = vadd.f32 %v2028_v47, %v1213_v50 }
 0x280   : > { %v2029_v52 = vadd.f32 %v1195_v51, %v953_v40  ;;  %v1197_v53 = vpop.f32.mrb[3].mxu1 }
 0x281   : > { %v2030_v45 = vadd.f32 %v1197_v53, %v955_v41 }
 0x282   : > { %v2589_v54 = vadd.f32 %v2029_v52, %v1209_v49 }
 0x283   : > { %v2593_v55 = vadd.f32 %v2030_v45, %v1213_v50 }
 0x284   : > { %v1220_v56 = vadd.f32 %v2589_v54, %v2587_v48 }
 0x285   : > { %v1227_v57 = vadd.f32 %v2593_v55, %v2591_v7 }
 0x286   : > { %v1221_v58 = vrot.slane %v1220_v56, 4 }
 0x287   : > { %v1228_v59 = vrot.slane %v1227_v57, 4 }
 0x288   : > { %v1222_v60 = vadd.f32 %v1221_v58, %v1220_v56  ;;  %v1469_v56 = vld [vmem:[%s2729_s8] sm:$0x3] }
 0x289   : > { %v1229_v61 = vadd.f32 %v1228_v59, %v1227_v57  ;;  %v1474_v57 = vrot.slane %v1469_v56, %v2454_v24  ;;  %v1478_v59 = vrot.slane %v1469_v56, %v2459_v26 }
 0x28a   : > { %v1223_v62 = vrot.slane %v1222_v60, 2 }
 0x28b   : > { %v1230_v63 = vrot.slane %v1229_v61, 2  ;;  %v1553_v42 = vpop.f32.mrb[4].mxu1 }
 0x28c   : > { %v1224_v1 = vadd.f32 %v1223_v62, %v1222_v60  ;;  %v1555_v43 = vpop.f32.mrb[5].mxu1 }
 0x28d   : > { %v1231_v2 = vadd.f32 %v1230_v63, %v1229_v61 }
 0x28e   : > { %v1225_v3 = vrot.slane %v1224_v1, 1 }
 0x28f   : > { %v1232_v4 = vrot.slane %v1231_v2, 1  ;;  %v1559_v44 = vpop.f32.mrb[6].mxu1 }
 0x290   : > { %v1226_v6 = vadd.f32 %v1225_v3, %v1224_v1  ;;  %v1561_v46 = vpop.f32.mrb[7].mxu1  ;;  %v1560_v62 = vadd.f32 %v1559_v44, %v1474_v57  ;;  %v1554_v3 = vadd.f32 %v1553_v42, %v1474_v57 }
 0x291   : > { %v1233_v5 = vadd.f32 %v1232_v4, %v1231_v2  ;;  %v1562_v1 = vadd.f32 %v1561_v46, %v1478_v59 }
 0x293   : > { %1330 = vmatprep.mubr.f32.mxu0 %v1233_v5 }
 0x294   : > { %1331 = vmatmul.mubr.f32.vlgmr.msra.gmra.mrb[8].mxu0 %v1226_v6  ;;  %v1556_v6 = vadd.f32 %v1555_v43, %v1478_v59 }
 0x295   : > { %1420 = vmatprep.mubr.f32.mxu0 %v2249_v0  ;;  %1692 = vmatpush1.msk.msra.mxu0 %vm1351_vm5, %v1690_v8 }
 0x367   : > { %v1736_v38 = vpop.f32.mrb[8].mxu0 }
 0x368   : > { %v1737_v39 = vpop.f32.mrb[9].mxu0 }
 0x369   : > { %v1738_v40 = vadd.f32 %v1737_v39, %v1736_v38 }
 0x36b   : > { %v1336_v41 = vmax.f32 %v1738_v40, 0.0 }
 0x36d   : > { %1693 = vmatmul.mubr.msk.f32.vlgmr.msra.gmra.mrb[10].mxu0 %vm1347_vm6, %v1336_v41 }
 0x440   : > { %v1422_v47 = vpop.f32.mrb[10].mxu0 }
 0x441   : > { %v1694_v49 = vmul.f32 -1.442695, %v1422_v47  ;;  %v1424_v50 = vpop.f32.mrb[11].mxu0 }
 0x442   : > { %v1695_v51 = vmul.f32 -1.442695, %v1424_v50 }
 0x443   : > { %2109 = vpow2.f32 %v1694_v49 }
 0x444   : > { %2111 = vpow2.f32 %v1695_v51 }
 0x44d   : > { %v2110_v0 = vpop.eup %2109 }
 0x44e   : > { %v2112_v52 = vpop.eup %2111  ;;  %v1433_v53 = vadd.f32 1.0, %v2110_v0 }
 0x44f   : > { %v1434_v45 = vadd.f32 1.0, %v2112_v52 }
 0x450   : > { %2113 = vrcp.f32 %v1433_v53 }
 0x451   : > { %2115 = vrcp.f32 %v1434_v45 }
 0x45a   : > { %v2114_v58 = vpop.eup %2113 }
 0x45b   : > { %v2116_v60 = vpop.eup %2115  ;;  %v1442_v61 = vrot.slane %v2114_v58, %v2454_v24 }
 0x45c   : > { %v1446_v63 = vrot.slane %v2116_v60, %v2454_v24 }
 0x45d   : > { %v1447_v2 = vmul.f32 %v1442_v61, %v2587_v48  ;;  %v1449_v4 = vmul.f32 %v1442_v61, %v2589_v54 }
 0x45e   : > { %v1448_v5 = vmul.f32 %v1446_v63, %v2591_v7  ;;  %v1450_v8 = vmul.f32 %v1446_v63, %v2593_v55 }
 0x45f   : > { %v1564_v26 = vadd.f32 %v1554_v3, %v1447_v2  ;;  %v1566_v9 = vadd.f32 %v1560_v62, %v1449_v4 }
 0x460   : > { %v1565_v10 = vadd.f32 %v1556_v6, %v1448_v5  ;;  %v1567_v24 = vadd.f32 %v1562_v1, %v1450_v8 }
 0x461   : > { %v1568_v11 = vmax.f32 %v1564_v26, 0.0  ;;  %v1570_v48 = vmax.f32 %v1566_v9, 0.0 }
 0x462   : > { %v1569_v54 = vmax.f32 %v1565_v10, 0.0  ;;  %v1571_v7 = vmax.f32 %v1567_v24, 0.0 }
 0x463   : > { %1572 = vst [vmem:[%s355_s23] sm:$0xff] %v1568_v11  ;;  %1574 = vst [vmem:[%s355_s23 + $0x10] sm:$0xff] %v1570_v48 }
 0x464   : > { %1573 = vst [vmem:[%s355_s23 + $0x8] sm:$0xff] %v1569_v54  ;;  %1575 = vst [vmem:[%s355_s23 + $0x18] sm:$0xff] %v1571_v7 }
 0x465   : > { %2186 = shalt.err (!%p2183_p11)
}
 0x466   : > { %s2187_s16 = scalar_lea.hbm %s2676_s24, 512  ;;  %s2191_s22 = scalar_lea.hbm %s2730_s9, 1024 }
 0x467   : > { %p2188_p13 = scmp.ne.s32.totalorder %s2676_s24, %s2187_s16  ;;  %p2192_p6 = scmp.lt.u32.totalorder %s2676_s24, %s2730_s9 }
 0x468   : > { %p2193_p9 = scmp.lt.u32.totalorder %s2191_s22, %s2187_s16  ;;  %p2195_p10 = scmp.lt.u32.totalorder %s2187_s16, %s2676_s24 }
 0x469   : > { %p2189_p5 = pnand %p2188_p13, %p2749_p1 }
 0x46a   : > { %p2194_p12 = por %p2193_p9, %p2192_p6 }
 0x46b   : > { %p2190_p0 = pneg %p2189_p5 }
 0x46c   : > { %p2196_p2 = por %p2195_p10, %p2194_p12 }
 0x46e   : > { %p2197_p3 = pnand %p2196_p2, %p2190_p0 }
 0x470   : > { %2200 = shalt.err (!%p2197_p3)
}
 0x471   : > { %s2251_s15 = smov 256   ;;  %s2252_s18 = smov 16  }
 0x472   : > { %2052 = dma.vmem_to_hbm [thread:$0]  (%p2749_p1), %s2671_s11, 512, %s2676_s24, %s2680_s13, %s2251_s15, %s2251_s15, %s2252_s18  }
 0x473 PF: > { %p2069_p4 = scmp.ge.s32.totalorder %s2243_s12, 2  ;;  %s1605_s21 = sand.u32 1, %s2231_s30  }
 0x474   : > { %p2750_p7 = scmp.ne.s32.totalorder %s2741_s20, 0  ;;  %s1606_s26 = scalar_lea.sflag [#allocation5], %s1605_s21 }
 0x476   : > { %p2062_p8 = pnand %p2069_p4, %p2750_p7 }
 0x478   : > { %2226 = dma.done.wait (!%p2062_p8), %s1606_s26, 512  }
 0x479   : > { %2228 = vsyncadd (!%p2062_p8), %s1606_s26, 4294966784  ;;  %s2751_s12 = sld [smem:[#allocation13_spill]]  ;;  %s2752_s28 = sld [smem:[#allocation12_spill]] }
 0x47a   : > { %s2753_s11 = sld [smem:[#allocation14_spill]]  ;;  %s2754_s30 = smov %s2235_s10 }
 0x47f   : > { %p21_p11 = scmp.ge.s32.totalorder %s2751_s12, 4   ;;  %s2755_s10 = smov %s2752_s28 }
 0x481   :  { %23 = sbr.rel (!%p21_p11) target bundleno = 5 (0x5), region = 105 }
 0x488   :  { %1611 = vsyncpa [#allocation4], 1 }
 0x489   :  { %1613 = vsyncpa [#allocation4 + $0x1], 1 }
 0x48a   :  { %1614 = vsyncpa [#allocation7], 1 }
 0x48b   :  { %1615 = vsyncpa [#allocation5], 1 }
 0x48c   :  { %1617 = vsyncpa [#allocation5 + $0x1], 1 }

</bundles_post_ra>
